<compile_context>
chip_gen: v5e
topology: v5e:2x2
jax: 0.10.0
libtpu: 0.0.40
codegen_flags: <defaults>
</compile_context>

<pallas_src>
import functools
import math

import jax
import jax.numpy as jnp
from jax.experimental import pallas as pl
from jax.experimental.pallas import tpu as pltpu

VMEM_LIMIT = 32 * 1024 * 1024  # safe on v5e/v6e/v7x


def _pick_tile(dim, pref, multiple):
    """Largest tile <= pref that divides dim (multiple-aligned), else the full dim."""
    if dim <= pref:
        return dim
    t = (pref // multiple) * multiple
    while t >= multiple:
        if dim % t == 0:
            return t
        t -= multiple
    return dim


# ------------------------- fused attention-block kernel -------------------------
# out = LayerNorm(x + OutProj(MultiHeadAttention(q=x, kv=mem)))

def _mha_ln_kernel(x_ref, mem_ref, wq_ref, bq_ref, wkv_ref, bkv_ref,
                   wo_ref, bo_ref, g_ref, b_ref, o_ref, *, nhead, eps):
    x = x_ref[0].astype(jnp.float32)        # [Sq, D]
    mem = mem_ref[0].astype(jnp.float32)    # [Sk, D]
    D = x.shape[-1]
    dh = D // nhead
    scale = 1.0 / math.sqrt(dh)

    xb = x.astype(jnp.bfloat16)
    mb = mem.astype(jnp.bfloat16)

    # fused projections: q = x @ Wq + bq ; [k|v] = mem @ Wkv + bkv   (bf16 MXU, fp32 acc)
    q = jnp.dot(xb, wq_ref[...], preferred_element_type=jnp.float32) + bq_ref[...]   # [Sq, D]
    kv = jnp.dot(mb, wkv_ref[...], preferred_element_type=jnp.float32) + bkv_ref[...]  # [Sk, 2D]
    k = kv[:, :D]
    v = kv[:, D:]

    heads = []
    for h in range(nhead):                  # static unroll over heads
        qh = q[:, h * dh:(h + 1) * dh].astype(jnp.bfloat16)
        kh = k[:, h * dh:(h + 1) * dh].astype(jnp.bfloat16)
        vh = v[:, h * dh:(h + 1) * dh].astype(jnp.bfloat16)
        s = jax.lax.dot_general(qh, kh, (((1,), (1,)), ((), ())),
                                preferred_element_type=jnp.float32) * scale  # [Sq, Sk]
        m = jnp.max(s, axis=-1, keepdims=True)
        p = jnp.exp(s - m)
        l = jnp.sum(p, axis=-1, keepdims=True)
        p = p * pl.reciprocal(l, approx=True)          # EUP slot instead of VPU divide
        heads.append(jnp.dot(p.astype(jnp.bfloat16), vh,
                             preferred_element_type=jnp.float32))
    attn = jnp.concatenate(heads, axis=-1)             # [Sq, D] lane-dense

    proj = jnp.dot(attn.astype(jnp.bfloat16), wo_ref[...],
                   preferred_element_type=jnp.float32) + bo_ref[...]

    # residual + LayerNorm (fp32)
    z = x + proj
    mean = jnp.mean(z, axis=-1, keepdims=True)
    var = jnp.mean((z - mean) ** 2, axis=-1, keepdims=True)   # biased, like torch LayerNorm
    zn = (z - mean) * jax.lax.rsqrt(var + eps)
    o_ref[0] = (zn * g_ref[...] + b_ref[...]).astype(o_ref.dtype)


def mha_ln_block(x, mem, p, gamma, beta, nhead, eps=1e-5):
    """x: [B, Sq, D] (queries), mem: [B, Sk, D] (keys/values). Returns LN(x + MHA(x, mem))."""
    B, Sq, D = x.shape
    Sk = mem.shape[1]
    const = lambda b: (0, 0)
    return pl.pallas_call(
        functools.partial(_mha_ln_kernel, nhead=nhead, eps=eps),
        out_shape=jax.ShapeDtypeStruct((B, Sq, D), jnp.float32),
        grid=(B,),
        in_specs=[
            pl.BlockSpec((1, Sq, D), lambda b: (b, 0, 0)),   # x
            pl.BlockSpec((1, Sk, D), lambda b: (b, 0, 0)),   # mem
            pl.BlockSpec((D, D), const),                      # wq  (bf16, resident)
            pl.BlockSpec((1, D), const),                      # bq
            pl.BlockSpec((D, 2 * D), const),                  # wkv (bf16, resident)
            pl.BlockSpec((1, 2 * D), const),                  # bkv
            pl.BlockSpec((D, D), const),                      # wo
            pl.BlockSpec((1, D), const),                      # bo
            pl.BlockSpec((1, D), const),                      # gamma
            pl.BlockSpec((1, D), const),                      # beta
        ],
        out_specs=pl.BlockSpec((1, Sq, D), lambda b: (b, 0, 0)),
        compiler_params=pltpu.CompilerParams(
            dimension_semantics=("parallel",),
            vmem_limit_bytes=VMEM_LIMIT),
    )(x, mem, p["wq"], p["bq"], p["wkv"], p["bkv"], p["wo"], p["bo"], gamma, beta)


# ------------------------- fused FFN-block kernel -------------------------
# out = LayerNorm(x + W2 @ relu(W1 @ x + b1) + b2)

def _ffn_ln_kernel(x_ref, w1_ref, b1_ref, w2_ref, b2_ref, g_ref, b_ref, o_ref, *, eps):
    x = x_ref[...].astype(jnp.float32)                                   # [tm, D]
    h = jnp.dot(x.astype(jnp.bfloat16), w1_ref[...],
                preferred_element_type=jnp.float32) + b1_ref[...]        # [tm, F]
    h = jnp.maximum(h, 0.0)
    y = jnp.dot(h.astype(jnp.bfloat16), w2_ref[...],
                preferred_element_type=jnp.float32) + b2_ref[...]        # [tm, D]
    z = x + y
    mean = jnp.mean(z, axis=-1, keepdims=True)
    var = jnp.mean((z - mean) ** 2, axis=-1, keepdims=True)
    zn = (z - mean) * jax.lax.rsqrt(var + eps)
    o_ref[...] = (zn * g_ref[...] + b_ref[...]).astype(o_ref.dtype)


def ffn_ln_block(x, p, gamma, beta, eps=1e-5):
    B, S, D = x.shape
    F = p["w1"].shape[1]
    M = B * S
    tm = _pick_tile(M, 256, 8)
    const = lambda i: (0, 0)
    out = pl.pallas_call(
        functools.partial(_ffn_ln_kernel, eps=eps),
        out_shape=jax.ShapeDtypeStruct((M, D), jnp.float32),
        grid=(pl.cdiv(M, tm),),
        in_specs=[
            pl.BlockSpec((tm, D), lambda i: (i, 0)),
            pl.BlockSpec((D, F), const),     # W1 (bf16, resident)
            pl.BlockSpec((1, F), const),
            pl.BlockSpec((F, D), const),     # W2 (bf16, resident)
            pl.BlockSpec((1, D), const),
            pl.BlockSpec((1, D), const),     # gamma
            pl.BlockSpec((1, D), const),     # beta
        ],
        out_specs=pl.BlockSpec((tm, D), lambda i: (i, 0)),
        compiler_params=pltpu.CompilerParams(
            dimension_semantics=("parallel",),
            vmem_limit_bytes=VMEM_LIMIT),
    )(x.reshape(M, D), p["w1"], p["b1"], p["w2"], p["b2"], gamma, beta)
    return out.reshape(B, S, D)


# ------------------------- general tiled linear (fc_out) -------------------------

def _matmul_kernel(x_ref, w_ref, b_ref, o_ref, acc_ref):
    @pl.when(pl.program_id(2) == 0)
    def _():
        acc_ref[...] = jnp.zeros_like(acc_ref)
    acc_ref[...] += jnp.dot(x_ref[...].astype(jnp.bfloat16), w_ref[...],
                            preferred_element_type=jnp.float32)
    @pl.when(pl.program_id(2) == pl.num_programs(2) - 1)
    def _():
        o_ref[...] = (acc_ref[...] + b_ref[...]).astype(o_ref.dtype)


def linear(x, w, b, *, tm_pref=256, tn_pref=256, tk_pref=512):
    """x: [M, K] fp32, w: [K, N] bf16 (pre-transposed), b: [1, N] fp32 -> [M, N] fp32."""
    M, K = x.shape
    N = w.shape[1]
    tm = _pick_tile(M, tm_pref, 8)
    tn = _pick_tile(N, tn_pref, 128)
    tk = _pick_tile(K, tk_pref, 128)
    cost = pl.CostEstimate(flops=2 * M * N * K, transcendentals=0,
                           bytes_accessed=M * K * 4 + K * N * 2 + M * N * 4)
    return pl.pallas_call(
        _matmul_kernel,
        out_shape=jax.ShapeDtypeStruct((M, N), jnp.float32),
        grid=(pl.cdiv(M, tm), pl.cdiv(N, tn), pl.cdiv(K, tk)),
        in_specs=[
            pl.BlockSpec((tm, tk), lambda i, j, k: (i, k)),
            pl.BlockSpec((tk, tn), lambda i, j, k: (k, j)),
            pl.BlockSpec((1, tn), lambda i, j, k: (0, j)),
        ],
        out_specs=pl.BlockSpec((tm, tn), lambda i, j, k: (i, j)),
        scratch_shapes=[pltpu.VMEM((tm, tn), jnp.float32)],
        compiler_params=pltpu.CompilerParams(
            dimension_semantics=("parallel", "parallel", "arbitrary"),
            vmem_limit_bytes=VMEM_LIMIT),
        cost_estimate=cost,
    )(x, w, b)


# ------------------------------ model glue (JAX) ------------------------------

def make_pe(max_len, d_model):
    position = jnp.arange(max_len, dtype=jnp.float32)[:, None]
    div_term = jnp.exp(jnp.arange(0, d_model, 2, dtype=jnp.float32)
                       * (-math.log(10000.0) / d_model))
    pe = jnp.zeros((max_len, d_model), jnp.float32)
    pe = pe.at[:, 0::2].set(jnp.sin(position * div_term))
    pe = pe.at[:, 1::2].set(jnp.cos(position * div_term))
    return pe


def transformer_forward(params, src_tokens, tgt_tokens, nhead):
    B, Ss = src_tokens.shape
    _, St = tgt_tokens.shape
    D = params["src_emb"].shape[1]
    pe = params["pe"]

    # Faithful to the reference: src.size(-1) is evaluated on the *token* tensor
    # (= seq_len) because the RHS is evaluated before reassignment.
    # TODO(synk): embedding gather + PE add done in plain JAX (no clean small Pallas win).
    src = params["src_emb"][src_tokens] * math.sqrt(Ss)
    tgt = params["tgt_emb"][tgt_tokens] * math.sqrt(St)
    src = src + pe[None, :Ss, :]
    tgt = tgt + pe[None, :St, :]
    # dropout layers are identity in eval/inference mode

    mem = src
    for lp in params["enc_layers"]:
        mem = mha_ln_block(mem, mem, lp["self_attn"], lp["ln1_g"], lp["ln1_b"], nhead)
        mem = ffn_ln_block(mem, lp["ffn"], lp["ln2_g"], lp["ln2_b"])

    out = tgt
    for lp in params["dec_layers"]:
        out = mha_ln_block(out, out, lp["self_attn"], lp["ln1_g"], lp["ln1_b"], nhead)
        out = mha_ln_block(out, mem, lp["cross_attn"], lp["ln2_g"], lp["ln2_b"], nhead)
        out = ffn_ln_block(out, lp["ffn"], lp["ln3_g"], lp["ln3_b"])

    logits = linear(out.reshape(B * St, D), params["fc_w"], params["fc_b"])
    return logits.reshape(B, St, -1)


# --------------------------- deterministic params ---------------------------
# Weights stored pre-transposed [Din, Dout] in bf16; biases / LN params fp32 2-D (1, N).

def _nrm(key, shape, scale=0.02, dtype=jnp.float32):
    return (scale * jax.random.normal(key, shape, dtype=jnp.float32)).astype(dtype)


def init_attn(key, D):
    k1, k2, k3 = jax.random.split(key, 3)
    return {"wq": _nrm(k1, (D, D), dtype=jnp.bfloat16),
            "bq": jnp.zeros((1, D), jnp.float32),
            "wkv": _nrm(k2, (D, 2 * D), dtype=jnp.bfloat16),
            "bkv": jnp.zeros((1, 2 * D), jnp.float32),
            "wo": _nrm(k3, (D, D), dtype=jnp.bfloat16),
            "bo": jnp.zeros((1, D), jnp.float32)}


def init_ffn(key, D, F):
    k1, k2 = jax.random.split(key)
    return {"w1": _nrm(k1, (D, F), dtype=jnp.bfloat16), "b1": jnp.zeros((1, F), jnp.float32),
            "w2": _nrm(k2, (F, D), dtype=jnp.bfloat16), "b2": jnp.zeros((1, D), jnp.float32)}


def _ln(D):
    return jnp.ones((1, D), jnp.float32), jnp.zeros((1, D), jnp.float32)


def init_enc_layer(key, D, F):
    ks = jax.random.split(key, 2)
    g1, b1 = _ln(D)
    g2, b2 = _ln(D)
    return {"self_attn": init_attn(ks[0], D), "ffn": init_ffn(ks[1], D, F),
            "ln1_g": g1, "ln1_b": b1, "ln2_g": g2, "ln2_b": b2}


def init_dec_layer(key, D, F):
    ks = jax.random.split(key, 3)
    g1, b1 = _ln(D)
    g2, b2 = _ln(D)
    g3, b3 = _ln(D)
    return {"self_attn": init_attn(ks[0], D), "cross_attn": init_attn(ks[1], D),
            "ffn": init_ffn(ks[2], D, F),
            "ln1_g": g1, "ln1_b": b1, "ln2_g": g2, "ln2_b": b2, "ln3_g": g3, "ln3_b": b3}


def init_params(key, src_vocab, tgt_vocab, D, F, n_enc, n_dec, max_len=5000):
    ks = jax.random.split(key, 4 + n_enc + n_dec)
    return {
        "src_emb": _nrm(ks[0], (src_vocab, D), scale=1.0),
        "tgt_emb": _nrm(ks[1], (tgt_vocab, D), scale=1.0),
        "fc_w": _nrm(ks[2], (D, tgt_vocab), dtype=jnp.bfloat16),   # pre-transposed [D, V]
        "fc_b": jnp.zeros((1, tgt_vocab), jnp.float32),
        "pe": make_pe(max_len, D),
        "enc_layers": [init_enc_layer(ks[4 + i], D, F) for i in range(n_enc)],
        "dec_layers": [init_dec_layer(ks[4 + n_enc + i], D, F) for i in range(n_dec)],
    }


# --------------------------------- driver -----------------------------------

if __name__ == "__main__":
    # small, TPU-friendly shapes
    SRC_VOCAB, TGT_VOCAB = 128, 128
    D_MODEL, NHEAD, DFF = 128, 4, 256
    N_ENC, N_DEC = 2, 2
    B, S_SRC, S_TGT = 2, 8, 8

    key = jax.random.PRNGKey(0)
    kp, ks, kt = jax.random.split(key, 3)
    params = init_params(kp, SRC_VOCAB, TGT_VOCAB, D_MODEL, DFF, N_ENC, N_DEC)

    src = jax.random.randint(ks, (B, S_SRC), 0, SRC_VOCAB, dtype=jnp.int32)
    tgt = jax.random.randint(kt, (B, S_TGT), 0, TGT_VOCAB, dtype=jnp.int32)

    fwd = jax.jit(functools.partial(transformer_forward, nhead=NHEAD))
    logits = fwd(params, src, tgt)
    jax.block_until_ready(logits)
    assert logits.shape == (B, S_TGT, TGT_VOCAB)
    assert bool(jnp.all(jnp.isfinite(logits)))
    print("KERNEL_OK")
</pallas_src>

<mosaic_0001>
module attributes {stable_mosaic.version = 11 : i64} {
  func.func @_matmul_kernel(%arg0: i32, %arg1: i32, %arg2: i32, %arg3: memref<16x128xf32, #tpu.memory_space<vmem>>, %arg4: memref<128x128xbf16, #tpu.memory_space<vmem>>, %arg5: memref<1x128xf32, #tpu.memory_space<vmem>>, %arg6: memref<16x128xf32, #tpu.memory_space<vmem>>, %arg7: memref<16x128xf32, #tpu.memory_space<vmem>>) attributes {dimension_semantics = [#tpu.dimension_semantics<parallel>, #tpu.dimension_semantics<parallel>, #tpu.dimension_semantics<arbitrary>], iteration_bounds = array<i64: 1, 1, 1>, scalar_prefetch = 0 : i64, scratch_operands = 1 : i64, tpu.core_type = #tpu.core_type<tc>, window_params = [{transform_indices = @transform_0, window_bounds = array<i64: 16, 128>}, {transform_indices = @transform_1, window_bounds = array<i64: 128, 128>}, {transform_indices = @transform_2, window_bounds = array<i64: 1, 128>}, {transform_indices = @transform_3, window_bounds = array<i64: 16, 128>}]} {
    %c0_i32 = arith.constant 0 : i32
    %0 = arith.cmpi eq, %arg2, %c0_i32 : i32
    %1 = arith.extui %0 : i1 to i32
    %c0_i32_0 = arith.constant 0 : i32
    %2 = arith.cmpi ne, %1, %c0_i32_0 : i32
    scf.if %2 {
      %cst_10 = arith.constant 0.000000e+00 : f32
      %13 = vector.broadcast %cst_10 : f32 to vector<16x128xf32>
      %c0_11 = arith.constant 0 : index
      %c0_12 = arith.constant 0 : index
      %14 = vector.load %arg7[%c0_11, %c0_12] : memref<16x128xf32, #tpu.memory_space<vmem>>, vector<16x128xf32>
      tpu.vector_store %arg7[%c0_11, %c0_12], %13 {strides = array<i32>} : memref<16x128xf32, #tpu.memory_space<vmem>>, vector<16x128xf32>,
    } else {
    }
    %c0 = arith.constant 0 : index
    %c0_1 = arith.constant 0 : index
    %3 = vector.load %arg7[%c0, %c0_1] : memref<16x128xf32, #tpu.memory_space<vmem>>, vector<16x128xf32>
    %c0_2 = arith.constant 0 : index
    %c0_3 = arith.constant 0 : index
    %4 = vector.load %arg3[%c0_2, %c0_3] : memref<16x128xf32, #tpu.memory_space<vmem>>, vector<16x128xf32>
    %5 = arith.truncf %4 : vector<16x128xf32> to vector<16x128xbf16>
    %c0_4 = arith.constant 0 : index
    %c0_5 = arith.constant 0 : index
    %6 = vector.load %arg4[%c0_4, %c0_5] : memref<128x128xbf16, #tpu.memory_space<vmem>>, vector<128x128xbf16>
    %cst = arith.constant dense<0.000000e+00> : vector<16x128xf32>
    %7 = tpu.matmul %5, %6, %cst {dimension_numbers = #tpu.dot_dimension_numbers<[1], [0], [0], [1], [0, 0, 1, 1], [], []>} : vector<16x128xbf16>, vector<128x128xbf16>, vector<16x128xf32> -> vector<16x128xf32>
    %8 = arith.addf %3, %7 : vector<16x128xf32>
    %c0_6 = arith.constant 0 : index
    %c0_7 = arith.constant 0 : index
    %9 = vector.load %arg7[%c0_6, %c0_7] : memref<16x128xf32, #tpu.memory_space<vmem>>, vector<16x128xf32>
    tpu.vector_store %arg7[%c0_6, %c0_7], %8 {strides = array<i32>} : memref<16x128xf32, #tpu.memory_space<vmem>>, vector<16x128xf32>,
    %c0_i32_8 = arith.constant 0 : i32
    %10 = arith.cmpi eq, %arg2, %c0_i32_8 : i32
    %11 = arith.extui %10 : i1 to i32
    %c0_i32_9 = arith.constant 0 : i32
    %12 = arith.cmpi ne, %11, %c0_i32_9 : i32
    scf.if %12 {
      %c0_10 = arith.constant 0 : index
      %c0_11 = arith.constant 0 : index
      %13 = vector.load %arg7[%c0_10, %c0_11] : memref<16x128xf32, #tpu.memory_space<vmem>>, vector<16x128xf32>
      %c0_12 = arith.constant 0 : index
      %c0_13 = arith.constant 0 : index
      %14 = vector.load %arg5[%c0_12, %c0_13] : memref<1x128xf32, #tpu.memory_space<vmem>>, vector<1x128xf32>
      %15 = vector.broadcast %14 : vector<1x128xf32> to vector<16x128xf32>
      %16 = arith.addf %13, %15 : vector<16x128xf32>
      %c0_14 = arith.constant 0 : index
      %c0_15 = arith.constant 0 : index
      %17 = vector.load %arg6[%c0_14, %c0_15] : memref<16x128xf32, #tpu.memory_space<vmem>>, vector<16x128xf32>
      tpu.vector_store %arg6[%c0_14, %c0_15], %16 {strides = array<i32>} : memref<16x128xf32, #tpu.memory_space<vmem>>, vector<16x128xf32>,
    } else {
    }
    return
  }
  func.func @transform_0(%arg0: i32, %arg1: i32, %arg2: i32) -> (i32, i32) {
    %c0_i32 = arith.constant 0 : i32
    return %arg0, %arg2 : i32, i32
  }
  func.func @transform_1(%arg0: i32, %arg1: i32, %arg2: i32) -> (i32, i32) {
    %c0_i32 = arith.constant 0 : i32
    return %arg2, %arg1 : i32, i32
  }
  func.func @transform_2(%arg0: i32, %arg1: i32, %arg2: i32) -> (i32, i32) {
    %c0_i32 = arith.constant 0 : i32
    %c0_i32_0 = arith.constant 0 : i32
    return %c0_i32, %arg1 : i32, i32
  }
  func.func @transform_3(%arg0: i32, %arg1: i32, %arg2: i32) -> (i32, i32) {
    %c0_i32 = arith.constant 0 : i32
    return %arg0, %arg1 : i32, i32
  }
}

module attributes {stable_mosaic.version = 11 : i64} {
  func.func @_ffn_ln_kernel(%arg0: i32, %arg1: memref<16x128xf32, #tpu.memory_space<vmem>>, %arg2: memref<128x256xbf16, #tpu.memory_space<vmem>>, %arg3: memref<1x256xf32, #tpu.memory_space<vmem>>, %arg4: memref<256x128xbf16, #tpu.memory_space<vmem>>, %arg5: memref<1x128xf32, #tpu.memory_space<vmem>>, %arg6: memref<1x128xf32, #tpu.memory_space<vmem>>, %arg7: memref<1x128xf32, #tpu.memory_space<vmem>>, %arg8: memref<16x128xf32, #tpu.memory_space<vmem>>) attributes {dimension_semantics = [#tpu.dimension_semantics<parallel>], iteration_bounds = array<i64: 1>, scalar_prefetch = 0 : i64, scratch_operands = 0 : i64, tpu.core_type = #tpu.core_type<tc>, window_params = [{transform_indices = @transform_0, window_bounds = array<i64: 16, 128>}, {pipeline_mode = #tpu.pipeline_mode<synchronous>, transform_indices = @transform_1, window_bounds = array<i64: 128, 256>}, {pipeline_mode = #tpu.pipeline_mode<synchronous>, transform_indices = @transform_2, window_bounds = array<i64: 1, 256>}, {pipeline_mode = #tpu.pipeline_mode<synchronous>, transform_indices = @transform_3, window_bounds = array<i64: 256, 128>}, {pipeline_mode = #tpu.pipeline_mode<synchronous>, transform_indices = @transform_4, window_bounds = array<i64: 1, 128>}, {pipeline_mode = #tpu.pipeline_mode<synchronous>, transform_indices = @transform_5, window_bounds = array<i64: 1, 128>}, {pipeline_mode = #tpu.pipeline_mode<synchronous>, transform_indices = @transform_6, window_bounds = array<i64: 1, 128>}, {transform_indices = @transform_7, window_bounds = array<i64: 16, 128>}]} {
    %c0 = arith.constant 0 : index
    %c0_0 = arith.constant 0 : index
    %0 = vector.load %arg1[%c0, %c0_0] : memref<16x128xf32, #tpu.memory_space<vmem>>, vector<16x128xf32>
    %1 = arith.truncf %0 : vector<16x128xf32> to vector<16x128xbf16>
    %c0_1 = arith.constant 0 : index
    %c0_2 = arith.constant 0 : index
    %2 = vector.load %arg2[%c0_1, %c0_2] : memref<128x256xbf16, #tpu.memory_space<vmem>>, vector<128x256xbf16>
    %cst = arith.constant dense<0.000000e+00> : vector<16x256xf32>
    %3 = tpu.matmul %1, %2, %cst {dimension_numbers = #tpu.dot_dimension_numbers<[1], [0], [0], [1], [0, 0, 1, 1], [], []>} : vector<16x128xbf16>, vector<128x256xbf16>, vector<16x256xf32> -> vector<16x256xf32>
    %c0_3 = arith.constant 0 : index
    %c0_4 = arith.constant 0 : index
    %4 = vector.load %arg3[%c0_3, %c0_4] : memref<1x256xf32, #tpu.memory_space<vmem>>, vector<1x256xf32>
    %5 = vector.broadcast %4 : vector<1x256xf32> to vector<16x256xf32>
    %6 = arith.addf %3, %5 : vector<16x256xf32>
    %cst_5 = arith.constant 0.000000e+00 : f32
    %7 = vector.broadcast %cst_5 : f32 to vector<16x256xf32>
    %8 = arith.maximumf %6, %7 : vector<16x256xf32>
    %9 = arith.truncf %8 : vector<16x256xf32> to vector<16x256xbf16>
    %c0_6 = arith.constant 0 : index
    %c0_7 = arith.constant 0 : index
    %10 = vector.load %arg4[%c0_6, %c0_7] : memref<256x128xbf16, #tpu.memory_space<vmem>>, vector<256x128xbf16>
    %cst_8 = arith.constant dense<0.000000e+00> : vector<16x128xf32>
    %11 = tpu.matmul %9, %10, %cst_8 {dimension_numbers = #tpu.dot_dimension_numbers<[1], [0], [0], [1], [0, 0, 1, 1], [], []>} : vector<16x256xbf16>, vector<256x128xbf16>, vector<16x128xf32> -> vector<16x128xf32>
    %c0_9 = arith.constant 0 : index
    %c0_10 = arith.constant 0 : index
    %12 = vector.load %arg5[%c0_9, %c0_10] : memref<1x128xf32, #tpu.memory_space<vmem>>, vector<1x128xf32>
    %13 = vector.broadcast %12 : vector<1x128xf32> to vector<16x128xf32>
    %14 = arith.addf %11, %13 : vector<16x128xf32>
    %15 = arith.addf %0, %14 : vector<16x128xf32>
    %cst_11 = arith.constant dense<0.000000e+00> : vector<16xf32>
    %16 = vector.multi_reduction <add>, %15, %cst_11 [1] : vector<16x128xf32> to vector<16xf32>
    %17 = vector.shape_cast %16 : vector<16xf32> to vector<16x1xf32>
    %cst_12 = arith.constant 1.280000e+02 : f32
    %18 = vector.broadcast %cst_12 : f32 to vector<16x1xf32>
    %19 = arith.divf %17, %18 : vector<16x1xf32>
    %20 = vector.broadcast %19 : vector<16x1xf32> to vector<16x128xf32>
    %21 = arith.subf %15, %20 : vector<16x128xf32>
    %22 = arith.mulf %21, %21 : vector<16x128xf32>
    %cst_13 = arith.constant dense<0.000000e+00> : vector<16xf32>
    %23 = vector.multi_reduction <add>, %22, %cst_13 [1] : vector<16x128xf32> to vector<16xf32>
    %24 = vector.shape_cast %23 : vector<16xf32> to vector<16x1xf32>
    %cst_14 = arith.constant 1.280000e+02 : f32
    %25 = vector.broadcast %cst_14 : f32 to vector<16x1xf32>
    %26 = arith.divf %24, %25 : vector<16x1xf32>
    %27 = vector.broadcast %19 : vector<16x1xf32> to vector<16x128xf32>
    %28 = arith.subf %15, %27 : vector<16x128xf32>
    %cst_15 = arith.constant 9.99999974E-6 : f32
    %29 = vector.broadcast %cst_15 : f32 to vector<16x1xf32>
    %30 = arith.addf %26, %29 : vector<16x1xf32>
    %31 = math.rsqrt %30 : vector<16x1xf32>
    %32 = vector.broadcast %31 : vector<16x1xf32> to vector<16x128xf32>
    %33 = arith.mulf %28, %32 : vector<16x128xf32>
    %c0_16 = arith.constant 0 : index
    %c0_17 = arith.constant 0 : index
    %34 = vector.load %arg6[%c0_16, %c0_17] : memref<1x128xf32, #tpu.memory_space<vmem>>, vector<1x128xf32>
    %35 = vector.broadcast %34 : vector<1x128xf32> to vector<16x128xf32>
    %36 = arith.mulf %33, %35 : vector<16x128xf32>
    %c0_18 = arith.constant 0 : index
    %c0_19 = arith.constant 0 : index
    %37 = vector.load %arg7[%c0_18, %c0_19] : memref<1x128xf32, #tpu.memory_space<vmem>>, vector<1x128xf32>
    %38 = vector.broadcast %37 : vector<1x128xf32> to vector<16x128xf32>
    %39 = arith.addf %36, %38 : vector<16x128xf32>
    %c0_20 = arith.constant 0 : index
    %c0_21 = arith.constant 0 : index
    %40 = vector.load %arg8[%c0_20, %c0_21] : memref<16x128xf32, #tpu.memory_space<vmem>>, vector<16x128xf32>
    tpu.vector_store %arg8[%c0_20, %c0_21], %39 {strides = array<i32>} : memref<16x128xf32, #tpu.memory_space<vmem>>, vector<16x128xf32>,
    return
  }
  func.func @transform_0(%arg0: i32) -> (i32, i32) {
    %c0_i32 = arith.constant 0 : i32
    %c0_i32_0 = arith.constant 0 : i32
    return %arg0, %c0_i32 : i32, i32
  }
  func.func @transform_1(%arg0: i32) -> (i32, i32) {
    %c0_i32 = arith.constant 0 : i32
    %c0_i32_0 = arith.constant 0 : i32
    %c0_i32_1 = arith.constant 0 : i32
    return %c0_i32, %c0_i32_0 : i32, i32
  }
  func.func @transform_2(%arg0: i32) -> (i32, i32) {
    %c0_i32 = arith.constant 0 : i32
    %c0_i32_0 = arith.constant 0 : i32
    %c0_i32_1 = arith.constant 0 : i32
    return %c0_i32, %c0_i32_0 : i32, i32
  }
  func.func @transform_3(%arg0: i32) -> (i32, i32) {
    %c0_i32 = arith.constant 0 : i32
    %c0_i32_0 = arith.constant 0 : i32
    %c0_i32_1 = arith.constant 0 : i32
    return %c0_i32, %c0_i32_0 : i32, i32
  }
  func.func @transform_4(%arg0: i32) -> (i32, i32) {
    %c0_i32 = arith.constant 0 : i32
    %c0_i32_0 = arith.constant 0 : i32
    %c0_i32_1 = arith.constant 0 : i32
    return %c0_i32, %c0_i32_0 : i32, i32
  }
  func.func @transform_5(%arg0: i32) -> (i32, i32) {
    %c0_i32 = arith.constant 0 : i32
    %c0_i32_0 = arith.constant 0 : i32
    %c0_i32_1 = arith.constant 0 : i32
    return %c0_i32, %c0_i32_0 : i32, i32
  }
  func.func @transform_6(%arg0: i32) -> (i32, i32) {
    %c0_i32 = arith.constant 0 : i32
    %c0_i32_0 = arith.constant 0 : i32
    %c0_i32_1 = arith.constant 0 : i32
    return %c0_i32, %c0_i32_0 : i32, i32
  }
  func.func @transform_7(%arg0: i32) -> (i32, i32) {
    %c0_i32 = arith.constant 0 : i32
    %c0_i32_0 = arith.constant 0 : i32
    return %arg0, %c0_i32 : i32, i32
  }
}

module attributes {stable_mosaic.version = 11 : i64} {
  func.func @_mha_ln_kernel(%arg0: i32, %arg1: memref<1x8x128xf32, #tpu.memory_space<vmem>>, %arg2: memref<1x8x128xf32, #tpu.memory_space<vmem>>, %arg3: memref<128x128xbf16, #tpu.memory_space<vmem>>, %arg4: memref<1x128xf32, #tpu.memory_space<vmem>>, %arg5: memref<128x256xbf16, #tpu.memory_space<vmem>>, %arg6: memref<1x256xf32, #tpu.memory_space<vmem>>, %arg7: memref<128x128xbf16, #tpu.memory_space<vmem>>, %arg8: memref<1x128xf32, #tpu.memory_space<vmem>>, %arg9: memref<1x128xf32, #tpu.memory_space<vmem>>, %arg10: memref<1x128xf32, #tpu.memory_space<vmem>>, %arg11: memref<1x8x128xf32, #tpu.memory_space<vmem>>) attributes {dimension_semantics = [#tpu.dimension_semantics<parallel>], iteration_bounds = array<i64: 2>, scalar_prefetch = 0 : i64, scratch_operands = 0 : i64, tpu.core_type = #tpu.core_type<tc>, window_params = [{transform_indices = @transform_0, window_bounds = array<i64: 1, 8, 128>}, {transform_indices = @transform_1, window_bounds = array<i64: 1, 8, 128>}, {pipeline_mode = #tpu.pipeline_mode<synchronous>, transform_indices = @transform_2, window_bounds = array<i64: 128, 128>}, {pipeline_mode = #tpu.pipeline_mode<synchronous>, transform_indices = @transform_3, window_bounds = array<i64: 1, 128>}, {pipeline_mode = #tpu.pipeline_mode<synchronous>, transform_indices = @transform_4, window_bounds = array<i64: 128, 256>}, {pipeline_mode = #tpu.pipeline_mode<synchronous>, transform_indices = @transform_5, window_bounds = array<i64: 1, 256>}, {pipeline_mode = #tpu.pipeline_mode<synchronous>, transform_indices = @transform_6, window_bounds = array<i64: 128, 128>}, {pipeline_mode = #tpu.pipeline_mode<synchronous>, transform_indices = @transform_7, window_bounds = array<i64: 1, 128>}, {pipeline_mode = #tpu.pipeline_mode<synchronous>, transform_indices = @transform_8, window_bounds = array<i64: 1, 128>}, {pipeline_mode = #tpu.pipeline_mode<synchronous>, transform_indices = @transform_9, window_bounds = array<i64: 1, 128>}, {transform_indices = @transform_10, window_bounds = array<i64: 1, 8, 128>}]} {
    %c0 = arith.constant 0 : index
    %c0_0 = arith.constant 0 : index
    %c0_1 = arith.constant 0 : index
    %0 = vector.load %arg1[%c0, %c0_0, %c0_1] : memref<1x8x128xf32, #tpu.memory_space<vmem>>, vector<1x8x128xf32>
    %1 = vector.shape_cast %0 : vector<1x8x128xf32> to vector<8x128xf32>
    %c0_2 = arith.constant 0 : index
    %c0_3 = arith.constant 0 : index
    %c0_4 = arith.constant 0 : index
    %2 = vector.load %arg2[%c0_2, %c0_3, %c0_4] : memref<1x8x128xf32, #tpu.memory_space<vmem>>, vector<1x8x128xf32>
    %3 = vector.shape_cast %2 : vector<1x8x128xf32> to vector<8x128xf32>
    %4 = arith.truncf %1 : vector<8x128xf32> to vector<8x128xbf16>
    %5 = arith.truncf %3 : vector<8x128xf32> to vector<8x128xbf16>
    %c0_5 = arith.constant 0 : index
    %c0_6 = arith.constant 0 : index
    %6 = vector.load %arg3[%c0_5, %c0_6] : memref<128x128xbf16, #tpu.memory_space<vmem>>, vector<128x128xbf16>
    %cst = arith.constant dense<0.000000e+00> : vector<8x128xf32>
    %7 = tpu.matmul %4, %6, %cst {dimension_numbers = #tpu.dot_dimension_numbers<[1], [0], [0], [1], [0, 0, 1, 1], [], []>} : vector<8x128xbf16>, vector<128x128xbf16>, vector<8x128xf32> -> vector<8x128xf32>
    %c0_7 = arith.constant 0 : index
    %c0_8 = arith.constant 0 : index
    %8 = vector.load %arg4[%c0_7, %c0_8] : memref<1x128xf32, #tpu.memory_space<vmem>>, vector<1x128xf32>
    %9 = vector.broadcast %8 : vector<1x128xf32> to vector<8x128xf32>
    %10 = arith.addf %7, %9 : vector<8x128xf32>
    %c0_9 = arith.constant 0 : index
    %c0_10 = arith.constant 0 : index
    %11 = vector.load %arg5[%c0_9, %c0_10] : memref<128x256xbf16, #tpu.memory_space<vmem>>, vector<128x256xbf16>
    %cst_11 = arith.constant dense<0.000000e+00> : vector<8x256xf32>
    %12 = tpu.matmul %5, %11, %cst_11 {dimension_numbers = #tpu.dot_dimension_numbers<[1], [0], [0], [1], [0, 0, 1, 1], [], []>} : vector<8x128xbf16>, vector<128x256xbf16>, vector<8x256xf32> -> vector<8x256xf32>
    %c0_12 = arith.constant 0 : index
    %c0_13 = arith.constant 0 : index
    %13 = vector.load %arg6[%c0_12, %c0_13] : memref<1x256xf32, #tpu.memory_space<vmem>>, vector<1x256xf32>
    %14 = vector.broadcast %13 : vector<1x256xf32> to vector<8x256xf32>
    %15 = arith.addf %12, %14 : vector<8x256xf32>
    %16 = vector.extract_strided_slice %15 {offsets = [0, 0], sizes = [8, 128], strides = [1, 1]} : vector<8x256xf32> to vector<8x128xf32>
    %17 = vector.extract_strided_slice %15 {offsets = [0, 128], sizes = [8, 128], strides = [1, 1]} : vector<8x256xf32> to vector<8x128xf32>
    %18 = vector.extract_strided_slice %10 {offsets = [0, 0], sizes = [8, 32], strides = [1, 1]} : vector<8x128xf32> to vector<8x32xf32>
    %19 = arith.truncf %18 : vector<8x32xf32> to vector<8x32xbf16>
    %20 = vector.extract_strided_slice %16 {offsets = [0, 0], sizes = [8, 32], strides = [1, 1]} : vector<8x128xf32> to vector<8x32xf32>
    %21 = arith.truncf %20 : vector<8x32xf32> to vector<8x32xbf16>
    %22 = vector.extract_strided_slice %17 {offsets = [0, 0], sizes = [8, 32], strides = [1, 1]} : vector<8x128xf32> to vector<8x32xf32>
    %23 = arith.truncf %22 : vector<8x32xf32> to vector<8x32xbf16>
    %cst_14 = arith.constant dense<0.000000e+00> : vector<8x8xf32>
    %24 = tpu.matmul %19, %21, %cst_14 {dimension_numbers = #tpu.dot_dimension_numbers<[1], [1], [0], [0], [0, 0, 1, 0], [], []>} : vector<8x32xbf16>, vector<8x32xbf16>, vector<8x8xf32> -> vector<8x8xf32>
    %cst_15 = arith.constant 0.176776692 : f32
    %25 = vector.broadcast %cst_15 : f32 to vector<8x8xf32>
    %26 = arith.mulf %24, %25 : vector<8x8xf32>
    %cst_16 = arith.constant dense<0xFF800000> : vector<8xf32>
    %27 = vector.multi_reduction <maximumf>, %26, %cst_16 [1] : vector<8x8xf32> to vector<8xf32>
    %28 = vector.shape_cast %27 : vector<8xf32> to vector<8x1xf32>
    %29 = vector.broadcast %28 : vector<8x1xf32> to vector<8x8xf32>
    %30 = arith.subf %26, %29 : vector<8x8xf32>
    %31 = math.exp %30 : vector<8x8xf32>
    %cst_17 = arith.constant dense<0.000000e+00> : vector<8xf32>
    %32 = vector.multi_reduction <add>, %31, %cst_17 [1] : vector<8x8xf32> to vector<8xf32>
    %33 = vector.shape_cast %32 : vector<8xf32> to vector<8x1xf32>
    %34 = tpu.reciprocal %33 {approx = true} : vector<8x1xf32> -> vector<8x1xf32>
    %35 = vector.broadcast %34 : vector<8x1xf32> to vector<8x8xf32>
    %36 = arith.mulf %31, %35 : vector<8x8xf32>
    %37 = arith.truncf %36 : vector<8x8xf32> to vector<8x8xbf16>
    %cst_18 = arith.constant dense<0.000000e+00> : vector<8x32xf32>
    %38 = tpu.matmul %37, %23, %cst_18 {dimension_numbers = #tpu.dot_dimension_numbers<[1], [0], [0], [1], [0, 0, 1, 1], [], []>} : vector<8x8xbf16>, vector<8x32xbf16>, vector<8x32xf32> -> vector<8x32xf32>
    %39 = vector.extract_strided_slice %10 {offsets = [0, 32], sizes = [8, 32], strides = [1, 1]} : vector<8x128xf32> to vector<8x32xf32>
    %40 = arith.truncf %39 : vector<8x32xf32> to vector<8x32xbf16>
    %41 = vector.extract_strided_slice %16 {offsets = [0, 32], sizes = [8, 32], strides = [1, 1]} : vector<8x128xf32> to vector<8x32xf32>
    %42 = arith.truncf %41 : vector<8x32xf32> to vector<8x32xbf16>
    %43 = vector.extract_strided_slice %17 {offsets = [0, 32], sizes = [8, 32], strides = [1, 1]} : vector<8x128xf32> to vector<8x32xf32>
    %44 = arith.truncf %43 : vector<8x32xf32> to vector<8x32xbf16>
    %cst_19 = arith.constant dense<0.000000e+00> : vector<8x8xf32>
    %45 = tpu.matmul %40, %42, %cst_19 {dimension_numbers = #tpu.dot_dimension_numbers<[1], [1], [0], [0], [0, 0, 1, 0], [], []>} : vector<8x32xbf16>, vector<8x32xbf16>, vector<8x8xf32> -> vector<8x8xf32>
    %cst_20 = arith.constant 0.176776692 : f32
    %46 = vector.broadcast %cst_20 : f32 to vector<8x8xf32>
    %47 = arith.mulf %45, %46 : vector<8x8xf32>
    %cst_21 = arith.constant dense<0xFF800000> : vector<8xf32>
    %48 = vector.multi_reduction <maximumf>, %47, %cst_21 [1] : vector<8x8xf32> to vector<8xf32>
    %49 = vector.shape_cast %48 : vector<8xf32> to vector<8x1xf32>
    %50 = vector.broadcast %49 : vector<8x1xf32> to vector<8x8xf32>
    %51 = arith.subf %47, %50 : vector<8x8xf32>
    %52 = math.exp %51 : vector<8x8xf32>
    %cst_22 = arith.constant dense<0.000000e+00> : vector<8xf32>
    %53 = vector.multi_reduction <add>, %52, %cst_22 [1] : vector<8x8xf32> to vector<8xf32>
    %54 = vector.shape_cast %53 : vector<8xf32> to vector<8x1xf32>
    %55 = tpu.reciprocal %54 {approx = true} : vector<8x1xf32> -> vector<8x1xf32>
    %56 = vector.broadcast %55 : vector<8x1xf32> to vector<8x8xf32>
    %57 = arith.mulf %52, %56 : vector<8x8xf32>
    %58 = arith.truncf %57 : vector<8x8xf32> to vector<8x8xbf16>
    %cst_23 = arith.constant dense<0.000000e+00> : vector<8x32xf32>
    %59 = tpu.matmul %58, %44, %cst_23 {dimension_numbers = #tpu.dot_dimension_numbers<[1], [0], [0], [1], [0, 0, 1, 1], [], []>} : vector<8x8xbf16>, vector<8x32xbf16>, vector<8x32xf32> -> vector<8x32xf32>
    %60 = vector.extract_strided_slice %10 {offsets = [0, 64], sizes = [8, 32], strides = [1, 1]} : vector<8x128xf32> to vector<8x32xf32>
    %61 = arith.truncf %60 : vector<8x32xf32> to vector<8x32xbf16>
    %62 = vector.extract_strided_slice %16 {offsets = [0, 64], sizes = [8, 32], strides = [1, 1]} : vector<8x128xf32> to vector<8x32xf32>
    %63 = arith.truncf %62 : vector<8x32xf32> to vector<8x32xbf16>
    %64 = vector.extract_strided_slice %17 {offsets = [0, 64], sizes = [8, 32], strides = [1, 1]} : vector<8x128xf32> to vector<8x32xf32>
    %65 = arith.truncf %64 : vector<8x32xf32> to vector<8x32xbf16>
    %cst_24 = arith.constant dense<0.000000e+00> : vector<8x8xf32>
    %66 = tpu.matmul %61, %63, %cst_24 {dimension_numbers = #tpu.dot_dimension_numbers<[1], [1], [0], [0], [0, 0, 1, 0], [], []>} : vector<8x32xbf16>, vector<8x32xbf16>, vector<8x8xf32> -> vector<8x8xf32>
    %cst_25 = arith.constant 0.176776692 : f32
    %67 = vector.broadcast %cst_25 : f32 to vector<8x8xf32>
    %68 = arith.mulf %66, %67 : vector<8x8xf32>
    %cst_26 = arith.constant dense<0xFF800000> : vector<8xf32>
    %69 = vector.multi_reduction <maximumf>, %68, %cst_26 [1] : vector<8x8xf32> to vector<8xf32>
    %70 = vector.shape_cast %69 : vector<8xf32> to vector<8x1xf32>
    %71 = vector.broadcast %70 : vector<8x1xf32> to vector<8x8xf32>
    %72 = arith.subf %68, %71 : vector<8x8xf32>
    %73 = math.exp %72 : vector<8x8xf32>
    %cst_27 = arith.constant dense<0.000000e+00> : vector<8xf32>
    %74 = vector.multi_reduction <add>, %73, %cst_27 [1] : vector<8x8xf32> to vector<8xf32>
    %75 = vector.shape_cast %74 : vector<8xf32> to vector<8x1xf32>
    %76 = tpu.reciprocal %75 {approx = true} : vector<8x1xf32> -> vector<8x1xf32>
    %77 = vector.broadcast %76 : vector<8x1xf32> to vector<8x8xf32>
    %78 = arith.mulf %73, %77 : vector<8x8xf32>
    %79 = arith.truncf %78 : vector<8x8xf32> to vector<8x8xbf16>
    %cst_28 = arith.constant dense<0.000000e+00> : vector<8x32xf32>
    %80 = tpu.matmul %79, %65, %cst_28 {dimension_numbers = #tpu.dot_dimension_numbers<[1], [0], [0], [1], [0, 0, 1, 1], [], []>} : vector<8x8xbf16>, vector<8x32xbf16>, vector<8x32xf32> -> vector<8x32xf32>
    %81 = vector.extract_strided_slice %10 {offsets = [0, 96], sizes = [8, 32], strides = [1, 1]} : vector<8x128xf32> to vector<8x32xf32>
    %82 = arith.truncf %81 : vector<8x32xf32> to vector<8x32xbf16>
    %83 = vector.extract_strided_slice %16 {offsets = [0, 96], sizes = [8, 32], strides = [1, 1]} : vector<8x128xf32> to vector<8x32xf32>
    %84 = arith.truncf %83 : vector<8x32xf32> to vector<8x32xbf16>
    %85 = vector.extract_strided_slice %17 {offsets = [0, 96], sizes = [8, 32], strides = [1, 1]} : vector<8x128xf32> to vector<8x32xf32>
    %86 = arith.truncf %85 : vector<8x32xf32> to vector<8x32xbf16>
    %cst_29 = arith.constant dense<0.000000e+00> : vector<8x8xf32>
    %87 = tpu.matmul %82, %84, %cst_29 {dimension_numbers = #tpu.dot_dimension_numbers<[1], [1], [0], [0], [0, 0, 1, 0], [], []>} : vector<8x32xbf16>, vector<8x32xbf16>, vector<8x8xf32> -> vector<8x8xf32>
    %cst_30 = arith.constant 0.176776692 : f32
    %88 = vector.broadcast %cst_30 : f32 to vector<8x8xf32>
    %89 = arith.mulf %87, %88 : vector<8x8xf32>
    %cst_31 = arith.constant dense<0xFF800000> : vector<8xf32>
    %90 = vector.multi_reduction <maximumf>, %89, %cst_31 [1] : vector<8x8xf32> to vector<8xf32>
    %91 = vector.shape_cast %90 : vector<8xf32> to vector<8x1xf32>
    %92 = vector.broadcast %91 : vector<8x1xf32> to vector<8x8xf32>
    %93 = arith.subf %89, %92 : vector<8x8xf32>
    %94 = math.exp %93 : vector<8x8xf32>
    %cst_32 = arith.constant dense<0.000000e+00> : vector<8xf32>
    %95 = vector.multi_reduction <add>, %94, %cst_32 [1] : vector<8x8xf32> to vector<8xf32>
    %96 = vector.shape_cast %95 : vector<8xf32> to vector<8x1xf32>
    %97 = tpu.reciprocal %96 {approx = true} : vector<8x1xf32> -> vector<8x1xf32>
    %98 = vector.broadcast %97 : vector<8x1xf32> to vector<8x8xf32>
    %99 = arith.mulf %94, %98 : vector<8x8xf32>
    %100 = arith.truncf %99 : vector<8x8xf32> to vector<8x8xbf16>
    %cst_33 = arith.constant dense<0.000000e+00> : vector<8x32xf32>
    %101 = tpu.matmul %100, %86, %cst_33 {dimension_numbers = #tpu.dot_dimension_numbers<[1], [0], [0], [1], [0, 0, 1, 1], [], []>} : vector<8x8xbf16>, vector<8x32xbf16>, vector<8x32xf32> -> vector<8x32xf32>
    %102 = tpu.concatenate %38, %59, %80, %101 in 1 : vector<8x32xf32>, vector<8x32xf32>, vector<8x32xf32>, vector<8x32xf32> -> vector<8x128xf32>
    %103 = arith.truncf %102 : vector<8x128xf32> to vector<8x128xbf16>
    %c0_34 = arith.constant 0 : index
    %c0_35 = arith.constant 0 : index
    %104 = vector.load %arg7[%c0_34, %c0_35] : memref<128x128xbf16, #tpu.memory_space<vmem>>, vector<128x128xbf16>
    %cst_36 = arith.constant dense<0.000000e+00> : vector<8x128xf32>
    %105 = tpu.matmul %103, %104, %cst_36 {dimension_numbers = #tpu.dot_dimension_numbers<[1], [0], [0], [1], [0, 0, 1, 1], [], []>} : vector<8x128xbf16>, vector<128x128xbf16>, vector<8x128xf32> -> vector<8x128xf32>
    %c0_37 = arith.constant 0 : index
    %c0_38 = arith.constant 0 : index
    %106 = vector.load %arg8[%c0_37, %c0_38] : memref<1x128xf32, #tpu.memory_space<vmem>>, vector<1x128xf32>
    %107 = vector.broadcast %106 : vector<1x128xf32> to vector<8x128xf32>
    %108 = arith.addf %105, %107 : vector<8x128xf32>
    %109 = arith.addf %1, %108 : vector<8x128xf32>
    %cst_39 = arith.constant dense<0.000000e+00> : vector<8xf32>
    %110 = vector.multi_reduction <add>, %109, %cst_39 [1] : vector<8x128xf32> to vector<8xf32>
    %111 = vector.shape_cast %110 : vector<8xf32> to vector<8x1xf32>
    %cst_40 = arith.constant 1.280000e+02 : f32
    %112 = vector.broadcast %cst_40 : f32 to vector<8x1xf32>
    %113 = arith.divf %111, %112 : vector<8x1xf32>
    %114 = vector.broadcast %113 : vector<8x1xf32> to vector<8x128xf32>
    %115 = arith.subf %109, %114 : vector<8x128xf32>
    %116 = arith.mulf %115, %115 : vector<8x128xf32>
    %cst_41 = arith.constant dense<0.000000e+00> : vector<8xf32>
    %117 = vector.multi_reduction <add>, %116, %cst_41 [1] : vector<8x128xf32> to vector<8xf32>
    %118 = vector.shape_cast %117 : vector<8xf32> to vector<8x1xf32>
    %cst_42 = arith.constant 1.280000e+02 : f32
    %119 = vector.broadcast %cst_42 : f32 to vector<8x1xf32>
    %120 = arith.divf %118, %119 : vector<8x1xf32>
    %121 = vector.broadcast %113 : vector<8x1xf32> to vector<8x128xf32>
    %122 = arith.subf %109, %121 : vector<8x128xf32>
    %cst_43 = arith.constant 9.99999974E-6 : f32
    %123 = vector.broadcast %cst_43 : f32 to vector<8x1xf32>
    %124 = arith.addf %120, %123 : vector<8x1xf32>
    %125 = math.rsqrt %124 : vector<8x1xf32>
    %126 = vector.broadcast %125 : vector<8x1xf32> to vector<8x128xf32>
    %127 = arith.mulf %122, %126 : vector<8x128xf32>
    %c0_44 = arith.constant 0 : index
    %c0_45 = arith.constant 0 : index
    %128 = vector.load %arg9[%c0_44, %c0_45] : memref<1x128xf32, #tpu.memory_space<vmem>>, vector<1x128xf32>
    %129 = vector.broadcast %128 : vector<1x128xf32> to vector<8x128xf32>
    %130 = arith.mulf %127, %129 : vector<8x128xf32>
    %c0_46 = arith.constant 0 : index
    %c0_47 = arith.constant 0 : index
    %131 = vector.load %arg10[%c0_46, %c0_47] : memref<1x128xf32, #tpu.memory_space<vmem>>, vector<1x128xf32>
    %132 = vector.broadcast %131 : vector<1x128xf32> to vector<8x128xf32>
    %133 = arith.addf %130, %132 : vector<8x128xf32>
    %c0_48 = arith.constant 0 : index
    %c0_49 = arith.constant 0 : index
    %c0_50 = arith.constant 0 : index
    %134 = vector.load %arg11[%c0_48, %c0_49, %c0_50] : memref<1x8x128xf32, #tpu.memory_space<vmem>>, vector<1x8x128xf32>
    %135 = vector.shape_cast %134 : vector<1x8x128xf32> to vector<8x128xf32>
    %136 = vector.shape_cast %133 : vector<8x128xf32> to vector<1x8x128xf32>
    tpu.vector_store %arg11[%c0_48, %c0_49, %c0_50], %136 {strides = array<i32>} : memref<1x8x128xf32, #tpu.memory_space<vmem>>, vector<1x8x128xf32>,
    return
  }
  func.func @transform_0(%arg0: i32) -> (i32, i32, i32) {
    %c0_i32 = arith.constant 0 : i32
    %c0_i32_0 = arith.constant 0 : i32
    %c0_i32_1 = arith.constant 0 : i32
    return %arg0, %c0_i32, %c0_i32_0 : i32, i32, i32
  }
  func.func @transform_1(%arg0: i32) -> (i32, i32, i32) {
    %c0_i32 = arith.constant 0 : i32
    %c0_i32_0 = arith.constant 0 : i32
    %c0_i32_1 = arith.constant 0 : i32
    return %arg0, %c0_i32, %c0_i32_0 : i32, i32, i32
  }
  func.func @transform_2(%arg0: i32) -> (i32, i32) {
    %c0_i32 = arith.constant 0 : i32
    %c0_i32_0 = arith.constant 0 : i32
    %c0_i32_1 = arith.constant 0 : i32
    return %c0_i32, %c0_i32_0 : i32, i32
  }
  func.func @transform_3(%arg0: i32) -> (i32, i32) {
    %c0_i32 = arith.constant 0 : i32
    %c0_i32_0 = arith.constant 0 : i32
    %c0_i32_1 = arith.constant 0 : i32
    return %c0_i32, %c0_i32_0 : i32, i32
  }
  func.func @transform_4(%arg0: i32) -> (i32, i32) {
    %c0_i32 = arith.constant 0 : i32
    %c0_i32_0 = arith.constant 0 : i32
    %c0_i32_1 = arith.constant 0 : i32
    return %c0_i32, %c0_i32_0 : i32, i32
  }
  func.func @transform_5(%arg0: i32) -> (i32, i32) {
    %c0_i32 = arith.constant 0 : i32
    %c0_i32_0 = arith.constant 0 : i32
    %c0_i32_1 = arith.constant 0 : i32
    return %c0_i32, %c0_i32_0 : i32, i32
  }
  func.func @transform_6(%arg0: i32) -> (i32, i32) {
    %c0_i32 = arith.constant 0 : i32
    %c0_i32_0 = arith.constant 0 : i32
    %c0_i32_1 = arith.constant 0 : i32
    return %c0_i32, %c0_i32_0 : i32, i32
  }
  func.func @transform_7(%arg0: i32) -> (i32, i32) {
    %c0_i32 = arith.constant 0 : i32
    %c0_i32_0 = arith.constant 0 : i32
    %c0_i32_1 = arith.constant 0 : i32
    return %c0_i32, %c0_i32_0 : i32, i32
  }
  func.func @transform_8(%arg0: i32) -> (i32, i32) {
    %c0_i32 = arith.constant 0 : i32
    %c0_i32_0 = arith.constant 0 : i32
    %c0_i32_1 = arith.constant 0 : i32
    return %c0_i32, %c0_i32_0 : i32, i32
  }
  func.func @transform_9(%arg0: i32) -> (i32, i32) {
    %c0_i32 = arith.constant 0 : i32
    %c0_i32_0 = arith.constant 0 : i32
    %c0_i32_1 = arith.constant 0 : i32
    return %c0_i32, %c0_i32_0 : i32, i32
  }
  func.func @transform_10(%arg0: i32) -> (i32, i32, i32) {
    %c0_i32 = arith.constant 0 : i32
    %c0_i32_0 = arith.constant 0 : i32
    %c0_i32_1 = arith.constant 0 : i32
    return %arg0, %c0_i32, %c0_i32_0 : i32, i32, i32
  }
}

</mosaic_0001>

<bundles_post_ra>
// kernel: transformer_forward.21
= control target key start
LH: loop header
LB: loop body
LE: loop exit
PB: predicated region body
PF: predicated region fallthrough
CT: control target
= control target key end

     0   :  { %8 = vsyncpa [#allocation4], 0  ;;  %s339_s0 = inlined_call_operand.vmem [shape: f32[16,128], index: 0, kind: input, shape index: {}]   ;;  %s340_s1 = inlined_call_operand.hbm [shape: bf16[128,128], index: 1, kind: input, shape index: {}]   ;;  %s341_s2 = inlined_call_operand.hbm [shape: f32[1,128], index: 2, kind: input, shape index: {}]   ;;  %s342_s3 = inlined_call_operand.hbm [shape: f32[16,128], index: 3, kind: output, shape index: {}]  }
   0x1   :  { %9 = vsyncpa [#allocation7], 0 }
   0x2   :  { %10 = vsyncpa [#allocation5], 0  ;;  %s17_s14 = sshll.u32 %s340_s1, 4  ;;  %s297_s15 = smov [#allocation3]   ;;  %s18_s14 = int_to_ptr.hbm [resolvable:$true] %s17_s14 }
   0x3   :  { %s19_s16 = sshll.u32 %s297_s15, 4  ;;  %s31_s19 = sshll.u32 %s341_s2, 4  ;;  %s20_s16 = int_to_ptr.vmem [resolvable:$true] %s19_s16  ;;  %s32_s19 = int_to_ptr.hbm [resolvable:$true] %s31_s19 }
   0x4   :  { %s298_s20 = smov 64   ;;  %s299_s21 = smov 4  }
   0x5   :  { %25 = dma.hbm_to_vmem [thread:$0]  %s18_s14, 1024, %s20_s16, [#allocation4], %s298_s20, %s298_s20, %s299_s21  }
   0x6   :  { %s300_s22 = smov [#allocation6]  }
   0x7   :  { %s33_s23 = sshll.u32 %s300_s22, 4  ;;  %s34_s23 = int_to_ptr.vmem [resolvable:$true] %s33_s23 }
   0x8   :  { %36 = dma.hbm_to_vmem [thread:$0]  %s32_s19, 16, %s34_s23, [#allocation7]  }
   0x9   :  { %291 = dma.done.wait [#allocation4], 1024  }
   0xa   :  { %292 = vsyncadd [#allocation4], 4294966272 }
   0xb   :  { %293 = dma.done.wait [#allocation7], 16  }
   0xc   :  { %294 = vsyncadd [#allocation7], 4294967280  ;;  %v210_v0 = vld [vmem:[#allocation3 + $0x38] sm:$0xff]  ;;  %v209_v1 = vld [vmem:[#allocation3 + $0x30] sm:$0xff]  ;;  %s301_s26 = smov [#allocation8]   ;;  %s157_s30 = sshll.u32 %s342_s3, 4  ;;  %s158_s30 = int_to_ptr.hbm [resolvable:$true] %s157_s30 }
   0xd   :  { %120 = vmatpush.bf16.msra.mxu0 %v210_v0  ;;  %v208_v2 = vld [vmem:[#allocation3 + $0x28] sm:$0xff]  ;;  %v207_v3 = vld [vmem:[#allocation3 + $0x20] sm:$0xff]  ;;  %v206_v4 = vld [vmem:[#allocation3 + $0x18] sm:$0xff]  ;;  %s155_s27 = sshll.u32 %s301_s26, 4  ;;  %s302_s4 = smov 128   ;;  %s156_s27 = int_to_ptr.vmem [resolvable:$true] %s155_s27 }
   0xe   :  { %v205_v5 = vld [vmem:[#allocation3 + $0x10] sm:$0xff]  ;;  %v204_v6 = vld [vmem:[#allocation3 + $0x8] sm:$0xff]  ;;  %v203_v7 = vld [vmem:[#allocation3] sm:$0xff] }
   0xf   :  { %v53_v8 = vld [vmem:[%s339_s0] sm:$0xff]  ;;  %v54_v9 = vld [vmem:[%s339_s0 + $0x8] sm:$0xff]  ;;  %s303_s0 = smov 8  }
  0x10   :  { %v55_v10 = vpack.c.bf16 %v54_v9, %v53_v8  ;;  %v218_v11 = vld [vmem:[#allocation6] ss:$0 sm:$0xff] }
  0x11   :  { %121 = vmatpush.bf16.msra.mxu0 %v209_v1 }
  0x15   :  { %122 = vmatpush.bf16.msra.mxu0 %v208_v2 }
  0x19   :  { %123 = vmatpush.bf16.msra.mxu0 %v207_v3 }
  0x1d   :  { %124 = vmatpush.bf16.msra.mxu0 %v206_v4 }
  0x21   :  { %125 = vmatpush.bf16.msra.mxu0 %v205_v5 }
  0x25   :  { %126 = vmatpush.bf16.msra.mxu0 %v204_v6 }
  0x29   :  { %127 = vmatpush.bf16.msra.mxu0 %v203_v7 }
  0x2c   :  { %128 = vmatmul.bf16.vlgmr.msra.gmra.mxu0 %v55_v10 }
  0xa9   :  { %v129_v12 = vpop.f32.mrf.mxu0 }
  0xaa   :  { %v147_v13 = vadd.f32 %v218_v11, %v129_v12 }
  0xac   :  { %149 = vst [vmem:[#allocation8] sm:$0xff] %v147_v13 }
  0xb1   :  { %v131_v14 = vpop.f32.mrf.mxu0 }
  0xb2   :  { %v148_v15 = vadd.f32 %v218_v11, %v131_v14 }
  0xb4   :  { %150 = vst [vmem:[#allocation8 + $0x8] sm:$0xff] %v148_v15 }
  0xb5   :  { %163 = dma.vmem_to_hbm [thread:$0]  %s156_s27, 256, %s158_s30, [#allocation5], %s302_s4, %s302_s4, %s303_s0  }
  0xb6   :  { %295 = dma.done.wait [#allocation5], 256  }
  0xb7   :  { %296 = vsyncadd [#allocation5], 4294967040 }
  0xb8   :  { %168 = vsyncpa [#allocation4], 1 }
  0xb9   :  { %169 = vsyncpa [#allocation7], 1 }
  0xba   :  { %170 = vsyncpa [#allocation5], 1 }

// kernel: transformer_forward.12
= control target key start
LH: loop header
LB: loop body
LE: loop exit
PB: predicated region body
PF: predicated region fallthrough
CT: control target
= control target key end

     0   :  { %12 = vsyncpa [#allocation3], 0  ;;  %s895_s0 = inlined_call_operand.vmem [shape: f32[16,128], index: 0, kind: input, shape index: {}]   ;;  %s896_s1 = inlined_call_operand.hbm [shape: bf16[128,256], index: 1, kind: input, shape index: {}]   ;;  %s897_s2 = inlined_call_operand.hbm [shape: f32[1,256], index: 2, kind: input, shape index: {}]   ;;  %s898_s3 = inlined_call_operand.hbm [shape: bf16[256,128], index: 3, kind: input, shape index: {}]   ;;  %s899_s4 = inlined_call_operand.hbm [shape: f32[1,128], index: 4, kind: input, shape index: {}]   ;;  %s900_s5 = inlined_call_operand.hbm [shape: f32[1,128], index: 5, kind: input, shape index: {}]   ;;  %s901_s6 = inlined_call_operand.hbm [shape: f32[1,128], index: 6, kind: input, shape index: {}]   ;;  %s902_s7 = inlined_call_operand.vmem [shape: f32[16,128], index: 7, kind: output, shape index: {}]  }
   0x1   :  { %13 = vsyncpa [#allocation5], 0 }
   0x2   :  { %14 = vsyncpa [#allocation8], 0  ;;  %s36_s26 = sshll.u32 %s897_s2, 4  ;;  %s37_s26 = int_to_ptr.hbm [resolvable:$true] %s36_s26 }
   0x3   :  { %15 = vsyncpa [#allocation11], 0  ;;  %s814_s27 = smov [#allocation4]   ;;  %s60_s8 = sshll.u32 %s899_s4, 4  ;;  %s61_s8 = int_to_ptr.hbm [resolvable:$true] %s60_s8 }
   0x4   :  { %s38_s28 = sshll.u32 %s814_s27, 4  ;;  %s815_s9 = smov [#allocation7]   ;;  %s39_s28 = int_to_ptr.vmem [resolvable:$true] %s38_s28 }
   0x5   :  { %41 = dma.hbm_to_vmem [thread:$0]  %s37_s26, 32, %s39_s28, [#allocation5]  }
   0x6   :  { %s62_s10 = sshll.u32 %s815_s9, 4  ;;  %s22_s13 = sshll.u32 %s896_s1, 4  ;;  %s63_s10 = int_to_ptr.vmem [resolvable:$true] %s62_s10  ;;  %s23_s13 = int_to_ptr.hbm [resolvable:$true] %s22_s13 }
   0x7   :  { %65 = dma.hbm_to_vmem [thread:$0]  %s61_s8, 16, %s63_s10, [#allocation8]  }
   0x8   :  { %s816_s2 = smov [#allocation2]   ;;  %s46_s17 = sshll.u32 %s898_s3, 4  ;;  %s47_s17 = int_to_ptr.hbm [resolvable:$true] %s46_s17 }
   0x9   :  { %s24_s14 = sshll.u32 %s816_s2, 4  ;;  %s817_s18 = smov 128   ;;  %s25_s14 = int_to_ptr.vmem [resolvable:$true] %s24_s14 }
   0xa   :  { %s818_s4 = smov 8   ;;  %s819_s19 = smov [#allocation6]  }
   0xb   :  { %30 = dma.hbm_to_vmem [thread:$0]  %s23_s13, 2048, %s25_s14, [#allocation3], %s817_s18, %s817_s18, %s818_s4  }
   0xc   :  { %s48_s20 = sshll.u32 %s819_s19, 4  ;;  %s820_s21 = smov 64   ;;  %s49_s20 = int_to_ptr.vmem [resolvable:$true] %s48_s20 }
   0xd   :  { %s821_s22 = smov 4   ;;  %s71_s24 = sshll.u32 %s900_s5, 4  ;;  %s72_s24 = int_to_ptr.hbm [resolvable:$true] %s71_s24 }
   0xe   :  { %54 = dma.hbm_to_vmem [thread:$0]  %s47_s17, 2048, %s49_s20, [#allocation5], %s820_s21, %s820_s21, %s821_s22  }
   0xf   :  { %s822_s25 = smov [#allocation9]   ;;  %s82_s28 = sshll.u32 %s901_s6, 4  ;;  %s83_s28 = int_to_ptr.hbm [resolvable:$true] %s82_s28 }
  0x10   :  { %s73_s26 = sshll.u32 %s822_s25, 4  ;;  %s823_s29 = smov [#allocation10]   ;;  %s74_s26 = int_to_ptr.vmem [resolvable:$true] %s73_s26 }
  0x11   :  { %76 = dma.hbm_to_vmem [thread:$0]  %s72_s24, 16, %s74_s26, [#allocation8]  }
  0x12   :  { %s84_s30 = sshll.u32 %s823_s29, 4  ;;  %s85_s30 = int_to_ptr.vmem [resolvable:$true] %s84_s30 }
  0x13   :  { %87 = dma.hbm_to_vmem [thread:$0]  %s83_s28, 16, %s85_s30, [#allocation11]  }
  0x14   :  { %806 = dma.done.wait [#allocation3], 2048  }
  0x15   :  { %807 = vsyncadd [#allocation3], 4294965248 }
  0x16   :  { %808 = dma.done.wait [#allocation5], 2080  }
  0x17   :  { %809 = vsyncadd [#allocation5], 4294965216 }
  0x18   :  { %810 = dma.done.wait [#allocation8], 32  }
  0x19   :  { %811 = vsyncadd [#allocation8], 4294967264 }
  0x1a   :  { %812 = dma.done.wait [#allocation11], 16  }
  0x1b   :  { %813 = vsyncadd [#allocation11], 4294967280  ;;  %v540_v0 = vld [vmem:[#allocation2 + $0x70] sm:$0xf]  ;;  %v625_v1 = vld [vmem:[#allocation2 + $0x74] sm:$0xf0] }
  0x1c   :  { %v624_v2 = vld [vmem:[#allocation2 + $0x74] sm:$0xf]  ;;  %v541_v3 = vor.u32 %v625_v1, %v540_v0  ;;  %v542_v4 = vld [vmem:[#allocation2 + $0x78] sm:$0xf0]  ;;  %v532_v5 = vld [vmem:[#allocation2 + $0x60] sm:$0xf] }
  0x1d   :  { %v623_v6 = vld [vmem:[#allocation2 + $0x64] sm:$0xf0]  ;;  %v545_v7 = vor.u32 %v624_v2, %v542_v4  ;;  %v622_v8 = vld [vmem:[#allocation2 + $0x64] sm:$0xf]  ;;  %v534_v9 = vld [vmem:[#allocation2 + $0x68] sm:$0xf0] }
  0x1e   :  { %217 = vmatpush.bf16.msra.mxu0 %v541_v3  ;;  %v533_v10 = vor.u32 %v623_v6, %v532_v5  ;;  %v537_v11 = vor.u32 %v622_v8, %v534_v9  ;;  %v524_v12 = vld [vmem:[#allocation2 + $0x50] sm:$0xf]  ;;  %v621_v13 = vld [vmem:[#allocation2 + $0x54] sm:$0xf0]  ;;  %v620_v14 = vld [vmem:[#allocation2 + $0x54] sm:$0xf] }
  0x1f   :  { %231 = vmatpush.bf16.msra.mxu1 %v545_v7  ;;  %v526_v15 = vld [vmem:[#allocation2 + $0x58] sm:$0xf0]  ;;  %v525_v16 = vor.u32 %v621_v13, %v524_v12  ;;  %v516_v18 = vld [vmem:[#allocation2 + $0x40] sm:$0xf]  ;;  %v619_v19 = vld [vmem:[#allocation2 + $0x44] sm:$0xf0] }
  0x20   :  { %v529_v17 = vor.u32 %v620_v14, %v526_v15  ;;  %v618_v20 = vld [vmem:[#allocation2 + $0x44] sm:$0xf]  ;;  %v518_v21 = vld [vmem:[#allocation2 + $0x48] sm:$0xf0]  ;;  %v517_v22 = vor.u32 %v619_v19, %v516_v18  ;;  %v633_v23 = vld [vmem:[#allocation6 + $0x38] sm:$0xff] }
  0x21   :  { %v641_v24 = vld [vmem:[#allocation6 + $0x78] sm:$0xff]  ;;  %v521_v25 = vor.u32 %v618_v20, %v518_v21  ;;  %v508_v26 = vld [vmem:[#allocation2 + $0x30] sm:$0xf]  ;;  %v616_v28 = vld [vmem:[#allocation2 + $0x34] sm:$0xf]  ;;  %383 = vmatpush.bf16.msra.mxu2 %v633_v23 }
  0x22   :  { %218 = vmatpush.bf16.msra.mxu0 %v533_v10  ;;  %v617_v27 = vld [vmem:[#allocation2 + $0x34] sm:$0xf0]  ;;  %v510_v29 = vld [vmem:[#allocation2 + $0x38] sm:$0xf0]  ;;  %397 = vmatpush.bf16.msra.mxu3 %v641_v24  ;;  %v500_v34 = vld [vmem:[#allocation2 + $0x20] sm:$0xf] }
  0x23   :  { %232 = vmatpush.bf16.msra.mxu1 %v537_v11  ;;  %v632_v30 = vld [vmem:[#allocation6 + $0x30] sm:$0xff]  ;;  %v509_v32 = vor.u32 %v617_v27, %v508_v26  ;;  %v513_v33 = vor.u32 %v616_v28, %v510_v29  ;;  %v615_v35 = vld [vmem:[#allocation2 + $0x24] sm:$0xf0]  ;;  %v614_v36 = vld [vmem:[#allocation2 + $0x24] sm:$0xf] }
  0x24   :  { %v640_v31 = vld [vmem:[#allocation6 + $0x70] sm:$0xff]  ;;  %v502_v37 = vld [vmem:[#allocation2 + $0x28] sm:$0xf0]  ;;  %v501_v40 = vor.u32 %v615_v35, %v500_v34  ;;  %v494_v45 = vld [vmem:[#allocation2 + $0x18] sm:$0xf0] }
  0x25   :  { %384 = vmatpush.bf16.msra.mxu2 %v632_v30  ;;  %v631_v38 = vld [vmem:[#allocation6 + $0x28] sm:$0xff]  ;;  %v505_v41 = vor.u32 %v614_v36, %v502_v37  ;;  %v613_v43 = vld [vmem:[#allocation2 + $0x14] sm:$0xf0]  ;;  %v612_v44 = vld [vmem:[#allocation2 + $0x14] sm:$0xf] }
  0x26   :  { %219 = vmatpush.bf16.msra.mxu0 %v525_v16  ;;  %398 = vmatpush.bf16.msra.mxu3 %v640_v31  ;;  %v639_v39 = vld [vmem:[#allocation6 + $0x68] sm:$0xff]  ;;  %v630_v46 = vld [vmem:[#allocation6 + $0x20] sm:$0xff]  ;;  %v497_v49 = vor.u32 %v612_v44, %v494_v45  ;;  %v629_v59 = vld [vmem:[#allocation6 + $0x18] sm:$0xff]  ;;  %v824_v31 = vmov 128.0  }
  0x27   :  { %233 = vmatpush.bf16.msra.mxu1 %v529_v17  ;;  %v492_v42 = vld [vmem:[#allocation2 + $0x10] sm:$0xf]  ;;  %v638_v47 = vld [vmem:[#allocation6 + $0x60] sm:$0xff]  ;;  %v486_v53 = vld [vmem:[#allocation2 + $0x8] sm:$0xf0]  ;;  %656 = vrcp.f32 %v824_v31 }
  0x28   :  { %v493_v48 = vor.u32 %v613_v43, %v492_v42  ;;  %v484_v50 = vld [vmem:[#allocation2] sm:$0xf]  ;;  %v611_v51 = vld [vmem:[#allocation2 + $0x4] sm:$0xf0]  ;;  %v610_v52 = vld [vmem:[#allocation2 + $0x4] sm:$0xf] }
  0x29   :  { %385 = vmatpush.bf16.msra.mxu2 %v631_v38  ;;  %v485_v54 = vor.u32 %v611_v51, %v484_v50  ;;  %v112_v55 = vld [vmem:[%s895_s0] sm:$0xff]  ;;  %v113_v56 = vld [vmem:[%s895_s0 + $0x8] sm:$0xff]  ;;  %v489_v57 = vor.u32 %v610_v52, %v486_v53  ;;  %v628_v61 = vld [vmem:[#allocation6 + $0x10] sm:$0xff] }
  0x2a   :  { %220 = vmatpush.bf16.msra.mxu0 %v517_v22  ;;  %399 = vmatpush.bf16.msra.mxu3 %v639_v39  ;;  %v114_v58 = vpack.c.bf16 %v113_v56, %v112_v55  ;;  %v637_v60 = vld [vmem:[#allocation6 + $0x58] sm:$0xff]  ;;  %v636_v62 = vld [vmem:[#allocation6 + $0x50] sm:$0xff]  ;;  %v627_v63 = vld [vmem:[#allocation6 + $0x8] sm:$0xff] }
  0x2b   :  { %234 = vmatpush.bf16.msra.mxu1 %v521_v25  ;;  %v635_v0 = vld [vmem:[#allocation6 + $0x48] sm:$0xff]  ;;  %v626_v1 = vld [vmem:[#allocation6] sm:$0xff]  ;;  %v131_v3 = vld [vmem:[#allocation4] sm:$0x3] }
  0x2c   :  { %v634_v2 = vld [vmem:[#allocation6 + $0x40] sm:$0xff]  ;;  %v133_v6 = vperm.slane %v131_v3, 0  ;;  %v134_v7 = vperm.slane %v131_v3, 1 }
  0x2d   :  { %386 = vmatpush.bf16.msra.mxu2 %v630_v46  ;;  %v653_v20 = vld [vmem:[#allocation7] ss:$0 sm:$0xff] }
  0x2e   :  { %221 = vmatpush.bf16.msra.mxu0 %v509_v32  ;;  %400 = vmatpush.bf16.msra.mxu3 %v638_v47  ;;  %v657_v32 = vpop.eup %656 }
  0x2f   :  { %235 = vmatpush.bf16.msra.mxu1 %v513_v33  ;;  %v418_v33 = vmul.f32 128.0, %v657_v32  ;;  %vm422_vm0 = vweird.f32 %v657_v32 }
  0x31   :  { %387 = vmatpush.bf16.msra.mxu2 %v629_v59  ;;  %v419_v34 = vsub.f32 1.0, %v418_v33 }
  0x32   :  { %222 = vmatpush.bf16.msra.mxu0 %v501_v40  ;;  %401 = vmatpush.bf16.msra.mxu3 %v637_v60  ;;  %v654_v60 = vld [vmem:[#allocation9] ss:$0 sm:$0xff] }
  0x33   :  { %236 = vmatpush.bf16.msra.mxu1 %v505_v41  ;;  %v420_v35 = vmul.f32 %v657_v32, %v419_v34 }
  0x35   :  { %388 = vmatpush.bf16.msra.mxu2 %v628_v61  ;;  %v421_v36 = vadd.f32 %v657_v32, %v420_v35 }
  0x36   :  { %223 = vmatpush.bf16.msra.mxu0 %v493_v48  ;;  %402 = vmatpush.bf16.msra.mxu3 %v636_v62 }
  0x37   :  { %237 = vmatpush.bf16.msra.mxu1 %v497_v49  ;;  %v423_v37 = vsel %vm422_vm0, %v657_v32, %v421_v36 }
  0x39   :  { %389 = vmatpush.bf16.msra.mxu2 %v627_v63  ;;  %v655_v63 = vld [vmem:[#allocation10] ss:$0 sm:$0xff] }
  0x3a   :  { %224 = vmatpush.bf16.msra.mxu0 %v485_v54  ;;  %403 = vmatpush.bf16.msra.mxu3 %v635_v0 }
  0x3b   :  { %238 = vmatpush.bf16.msra.mxu1 %v489_v57 }
  0x3d   :  { %225 = vmatmul.bf16.vlgmr.msra.gmra.mxu0 %v114_v58  ;;  %390 = vmatpush.bf16.msra.mxu2 %v626_v1 }
  0x3e   :  { %239 = vmatmul.bf16.vlgmr.msra.gmra.mxu1 %v114_v58  ;;  %404 = vmatpush.bf16.msra.mxu3 %v634_v2 }
  0xba   :  { %v226_v4 = vpop.f32.mrf.mxu0 }
  0xbb   :  { %v240_v5 = vpop.f32.mrf.mxu1  ;;  %v227_v8 = vadd.f32 %v226_v4, %v133_v6 }
  0xbc   :  { %v241_v9 = vadd.f32 %v240_v5, %v134_v7 }
  0xbd   :  { %v245_v14 = vmax.f32 %v227_v8, 0.0 }
  0xbe   :  { %v246_v16 = vmax.f32 %v241_v9, 0.0 }
  0xc2   :  { %v228_v10 = vpop.f32.mrf.mxu0 }
  0xc3   :  { %v229_v11 = vadd.f32 %v228_v10, %v133_v6  ;;  %v242_v12 = vpop.f32.mrf.mxu1 }
  0xc4   :  { %v243_v13 = vadd.f32 %v242_v12, %v134_v7 }
  0xc5   :  { %v247_v15 = vmax.f32 %v229_v11, 0.0 }
  0xc6   :  { %v248_v17 = vmax.f32 %v243_v13, 0.0 }
  0xc7   :  { %v249_v18 = vpack.c.bf16 %v247_v15, %v245_v14 }
  0xc8   :  { %v250_v19 = vpack.c.bf16 %v248_v17, %v246_v16 }
  0xc9   :  { %391 = vmatmul.bf16.vlgmr.msra.gmra.mxu2 %v249_v18 }
  0xca   :  { %405 = vmatmul.bf16.vlgmr.msra.gmra.mxu3 %v250_v19 }
 0x14c   :  { %v392_v21 = vpop.f32.mrf.mxu2 }
 0x14d   :  { %v393_v22 = vadd.f32 %v653_v20, %v392_v21  ;;  %v406_v23 = vpop.f32.mrf.mxu3 }
 0x14f   :  { %v407_v24 = vadd.f32 %v406_v23, %v393_v22 }
 0x151   :  { %v411_v25 = vadd.f32 %v407_v24, %v112_v55 }
 0x153   :  { %413 = vadd.xlane.f32.xlu0 %v411_v25 }
 0x154   :  { %v394_v26 = vpop.f32.mrf.mxu2 }
 0x155   :  { %v395_v27 = vadd.f32 %v653_v20, %v394_v26  ;;  %v408_v28 = vpop.f32.mrf.mxu3 }
 0x157   :  { %v409_v29 = vadd.f32 %v408_v28, %v395_v27 }
 0x159   :  { %v412_v30 = vadd.f32 %v409_v29, %v113_v56 }
 0x15b   :  { %415 = vadd.xlane.f32.xlu0 %v412_v30 }
 0x1c6   :  { %v414_v38 = vpop.xlane.xlu0 %413 }
 0x1c7   :  { %v424_v39 = vmul.f32 %v423_v37, %v414_v38 }
 0x1c9   :  { %v426_v40 = vsub.f32 %v411_v25, %v424_v39 }
 0x1cb   :  { %v428_v41 = vmul.f32 %v426_v40, %v426_v40 }
 0x1cd   :  { %430 = vadd.xlane.f32.xlu1 %v428_v41 }
 0x1ce   :  { %v416_v42 = vpop.xlane.xlu0 %415 }
 0x1cf   :  { %v425_v43 = vmul.f32 %v423_v37, %v416_v42 }
 0x1d1   :  { %v427_v44 = vsub.f32 %v412_v30, %v425_v43 }
 0x1d3   :  { %v429_v45 = vmul.f32 %v427_v44, %v427_v44 }
 0x1d5   :  { %432 = vadd.xlane.f32.xlu1 %v429_v45 }
 0x240   :  { %v431_v46 = vpop.xlane.xlu1 %430 }
 0x241   :  { %v434_v47 = vmul.f32 %v431_v46, %v423_v37 }
 0x243   :  { %v436_v48 = vadd.f32 1e-05, %v434_v47 }
 0x245   :  { %658 = vrsqrt.f32 %v436_v48  ;;  %vm444_vm2 = vweird.f32 %v436_v48 }
 0x248   :  { %v433_v49 = vpop.xlane.xlu1 %432 }
 0x249   :  { %v435_v50 = vmul.f32 %v433_v49, %v423_v37 }
 0x24b   :  { %v659_v51 = vpop.eup %658  ;;  %v437_v52 = vadd.f32 1e-05, %v435_v50 }
 0x24c   :  { %v439_v53 = vmul.f32 %v659_v51, %v436_v48  ;;  %vm445_vm1 = vweird.f32 %v659_v51 }
 0x24d   :  { %660 = vrsqrt.f32 %v437_v52  ;;  %vm446_vm3 = vmor %vm444_vm2, %vm445_vm1  ;;  %vm454_vm5 = vweird.f32 %v437_v52 }
 0x24e   :  { %v440_v54 = vmul.f32 %v659_v51, %v439_v53 }
 0x250   :  { %v441_v55 = vmul.f32 0.5, %v440_v54 }
 0x252   :  { %v442_v56 = vsub.f32 1.5, %v441_v55 }
 0x253   :  { %v661_v57 = vpop.eup %660 }
 0x254   :  { %v443_v58 = vmul.f32 %v659_v51, %v442_v56  ;;  %v449_v59 = vmul.f32 %v661_v57, %v437_v52  ;;  %vm455_vm4 = vweird.f32 %v661_v57 }
 0x255   :  { %vm456_vm6 = vmor %vm454_vm5, %vm455_vm4 }
 0x256   :  { %v447_v61 = vsel %vm446_vm3, %v659_v51, %v443_v58  ;;  %v450_v62 = vmul.f32 %v661_v57, %v449_v59 }
 0x257   :  { %v458_v0 = vmul.f32 %v447_v61, %v426_v40 }
 0x258   :  { %v451_v1 = vmul.f32 0.5, %v450_v62 }
 0x259   :  { %v464_v2 = vmul.f32 %v654_v60, %v458_v0 }
 0x25a   :  { %v452_v3 = vsub.f32 1.5, %v451_v1 }
 0x25b   :  { %v470_v4 = vadd.f32 %v655_v63, %v464_v2 }
 0x25c   :  { %v453_v5 = vmul.f32 %v661_v57, %v452_v3 }
 0x25d   :  { %472 = vst [vmem:[%s902_s7] sm:$0xff] %v470_v4 }
 0x25e   :  { %v457_v6 = vsel %vm456_vm6, %v661_v57, %v453_v5 }
 0x25f   :  { %v459_v7 = vmul.f32 %v457_v6, %v427_v44 }
 0x261   :  { %v465_v8 = vmul.f32 %v654_v60, %v459_v7 }
 0x263   :  { %v471_v9 = vadd.f32 %v655_v63, %v465_v8 }
 0x265   :  { %473 = vst [vmem:[%s902_s7 + $0x8] sm:$0xff] %v471_v9 }
 0x266   :  { %478 = vsyncpa [#allocation3], 1 }
 0x267   :  { %479 = vsyncpa [#allocation5], 1 }
 0x268   :  { %480 = vsyncpa [#allocation8], 1 }
 0x269   :  { %481 = vsyncpa [#allocation11], 1 }

// kernel: transformer_forward.11
= control target key start
LH: loop header
LB: loop body
LE: loop exit
PB: predicated region body
PF: predicated region fallthrough
CT: control target
= control target key end

     0   :  { %s2031_s0 = inlined_call_operand.vmem [shape: f32[2,8,128], index: 0, kind: input, shape index: {}, may-alias: {0,1}]   ;;  %s2032_s1 = inlined_call_operand.vmem [shape: f32[2,8,128], index: 1, kind: input, shape index: {}, may-alias: {0,1}]   ;;  %s2033_s2 = inlined_call_operand.hbm [shape: bf16[128,128], index: 2, kind: input, shape index: {}]   ;;  %s2034_s3 = inlined_call_operand.hbm [shape: f32[1,128], index: 3, kind: input, shape index: {}]   ;;  %s2035_s4 = inlined_call_operand.hbm [shape: bf16[128,256], index: 4, kind: input, shape index: {}]   ;;  %s2036_s5 = inlined_call_operand.hbm [shape: f32[1,256], index: 5, kind: input, shape index: {}]   ;;  %s2037_s6 = inlined_call_operand.hbm [shape: bf16[128,128], index: 6, kind: input, shape index: {}]   ;;  %s2038_s7 = inlined_call_operand.hbm [shape: f32[1,128], index: 7, kind: input, shape index: {}]   ;;  %s2039_s8 = inlined_call_operand.hbm [shape: f32[1,128], index: 8, kind: input, shape index: {}]   ;;  %s2040_s9 = inlined_call_operand.hbm [shape: f32[1,128], index: 9, kind: input, shape index: {}]   ;;  %s2041_s10 = inlined_call_operand.vmem [shape: f32[2,8,128], index: 10, kind: output, shape index: {}]  }
   0x1   :  { %2042 = sst [smem:[#allocation20_spill]] %s2033_s2 }
   0x2   :  { %15 = vsyncpa [#allocation3], 0 }
   0x3   :  { %16 = vsyncpa [#allocation5], 0 }
   0x4   :  { %17 = vsyncpa [#allocation8], 0 }
   0x5   :  { %18 = vsyncpa [#allocation11], 0 }
   0x6   :  { %19 = vsyncpa [#allocation14], 0  ;;  %s1876_s13 = smov 0  }
   0x7 LB: > { %s302_s16 = sshll.u32 %s2034_s3, 4  ;;  %s1885_s17 = sadd.s32 4294967295, %s1803_s13   ;;  %s1803_s13 = sphi %s1876_s13, %s25_s13   ;;  %s303_s16 = int_to_ptr.hbm [resolvable:$true] %s302_s16 }
   0x8   : > { %p1224_p0 = scmp.ge.s32.totalorder %s1803_s13, 1  ;;  %p276_p1 = scmp.lt.s32.totalorder %s1803_s13, 3 }
   0x9   : > { %p1473_p2 = scmp.eq.s32.totalorder %s1885_s17, 0  ;;  %s1805_s19 = smov [#allocation4]  }
   0xa   : > { %p1890_p3 = pnand %p1224_p0, %p276_p1  ;;  %s304_s20 = sshll.u32 %s1805_s19, 4  ;;  %s305_s20 = int_to_ptr.vmem [resolvable:$true] %s304_s20 }
   0xb   : > { %s328_s23 = sshll.u32 %s2036_s5, 4  ;;  %s354_s26 = sshll.u32 %s2038_s7, 4  ;;  %s329_s23 = int_to_ptr.hbm [resolvable:$true] %s328_s23  ;;  %s355_s26 = int_to_ptr.hbm [resolvable:$true] %s354_s26 }
   0xc   : > { %p1448_p4 = pneg %p1890_p3  ;;  %s1806_s28 = smov [#allocation7]  }
   0xd   : > { %s330_s29 = sshll.u32 %s1806_s28, 4  ;;  %s1807_s30 = smov [#allocation10]   ;;  %s331_s29 = int_to_ptr.vmem [resolvable:$true] %s330_s29 }
   0xe   : > { %p1904_p5 = pnand %p1473_p2, %p1448_p4  ;;  %s356_s11 = sshll.u32 %s1807_s30, 4  ;;  %s357_s11 = int_to_ptr.vmem [resolvable:$true] %s356_s11 }
   0xf   : > { %s2045_s2 = sld [smem:[#allocation20_spill]]  ;;  %s1808_s19 = smov [#allocation2]  }
  0x10   : > { %1454 = dma.hbm_to_vmem [thread:$0]  (!%p1904_p5), %s303_s16, 16, %s305_s20, [#allocation5]  }
  0x11   : > { %1460 = dma.hbm_to_vmem [thread:$0]  (!%p1904_p5), %s329_s23, 32, %s331_s29, [#allocation8]  }
  0x12   : > { %1466 = dma.hbm_to_vmem [thread:$0]  (!%p1904_p5), %s355_s26, 16, %s357_s11, [#allocation11]  }
  0x13   : > { %s289_s21 = sshll.u32 %s1808_s19, 4  ;;  %s313_s16 = sshll.u32 %s2035_s4, 4  ;;  %s290_s21 = int_to_ptr.vmem [resolvable:$true] %s289_s21  ;;  %s314_s16 = int_to_ptr.hbm [resolvable:$true] %s313_s16 }
  0x14   : > { %s1809_s20 = smov 64   ;;  %s1810_s23 = smov 4  }
  0x15   : > { %s287_s15 = sshll.u32 %s2045_s2, 4  ;;  %s1811_s25 = smov [#allocation6]   ;;  %s288_s15 = int_to_ptr.hbm [resolvable:$true] %s287_s15 }
  0x16   : > { %1451 = dma.hbm_to_vmem [thread:$0]  (!%p1904_p5), %s288_s15, 1024, %s290_s21, [#allocation3], %s1809_s20, %s1809_s20, %s1810_s23  }
  0x17   : > { %s315_s28 = sshll.u32 %s1811_s25, 4  ;;  %s1812_s29 = smov 128   ;;  %s316_s28 = int_to_ptr.vmem [resolvable:$true] %s315_s28 }
  0x18   : > { %s1813_s30 = smov 8   ;;  %s339_s12 = sshll.u32 %s2037_s6, 4  ;;  %s340_s12 = int_to_ptr.hbm [resolvable:$true] %s339_s12 }
  0x19   : > { %1457 = dma.hbm_to_vmem [thread:$0]  (!%p1904_p5), %s314_s16, 2048, %s316_s28, [#allocation5], %s1812_s29, %s1812_s29, %s1813_s30  }
  0x1a   : > { %s1814_s14 = smov [#allocation9]   ;;  %s366_s21 = sshll.u32 %s2039_s8, 4  ;;  %s367_s21 = int_to_ptr.hbm [resolvable:$true] %s366_s21 }
  0x1b   : > { %s341_s19 = sshll.u32 %s1814_s14, 4  ;;  %s1815_s24 = smov [#allocation12]   ;;  %s342_s19 = int_to_ptr.vmem [resolvable:$true] %s341_s19 }
  0x1c   : > { %1463 = dma.hbm_to_vmem [thread:$0]  (!%p1904_p5), %s340_s12, 1024, %s342_s19, [#allocation8], %s1809_s20, %s1809_s20, %s1810_s23  }
  0x1d   : > { %s368_s25 = sshll.u32 %s1815_s24, 4  ;;  %s378_s28 = sshll.u32 %s2040_s9, 4  ;;  %s369_s25 = int_to_ptr.vmem [resolvable:$true] %s368_s25  ;;  %s379_s28 = int_to_ptr.hbm [resolvable:$true] %s378_s28 }
  0x1e   : > { %1469 = dma.hbm_to_vmem [thread:$0]  (!%p1904_p5), %s367_s21, 16, %s369_s25, [#allocation11]  }
  0x1f   : > { %s1816_s29 = smov [#allocation13]   ;;  %407 = sbr.rel (%p1890_p3) target bundleno = 1689 (0x699), region = 60 }
  0x20   : > { %s380_s30 = sshll.u32 %s1816_s29, 4  ;;  %s381_s30 = int_to_ptr.vmem [resolvable:$true] %s380_s30 }
  0x21   : > { %1472 = dma.hbm_to_vmem [thread:$0]  (!%p1904_p5), %s379_s28, 16, %s381_s30, [#allocation14]  }
  0x24   : > { %1782 = dma.done.wait (%p1473_p2), [#allocation3], 1024  }
  0x25   : > { %1784 = vsyncadd (%p1473_p2), [#allocation3], 4294966272 }
  0x26   : > { %1786 = dma.done.wait (%p1473_p2), [#allocation5], 2064  }
  0x27   : > { %1788 = vsyncadd (%p1473_p2), [#allocation5], 4294965232 }
  0x28   : > { %1790 = dma.done.wait (%p1473_p2), [#allocation8], 1056  }
  0x29   : > { %1792 = vsyncadd (%p1473_p2), [#allocation8], 4294966240 }
  0x2a   : > { %1794 = dma.done.wait (%p1473_p2), [#allocation11], 32  }
  0x2b   : > { %1796 = vsyncadd (%p1473_p2), [#allocation11], 4294967264 }
  0x2c   : > { %1798 = dma.done.wait (%p1473_p2), [#allocation14], 16  }
  0x2d   : > { %1800 = vsyncadd (%p1473_p2), [#allocation14], 4294967280  ;;  %v1391_v0 = vld [vmem:[#allocation2 + $0x38] sm:$0xff]  ;;  %v1336_v1 = vld [vmem:[#allocation6 + $0x70] sm:$0xf]  ;;  %p483_p6 = scmp.lt.s32.totalorder %s1885_s17, 1 }
  0x2e   : > { %v1407_v2 = vld [vmem:[#allocation6 + $0x74] sm:$0xf0]  ;;  %v1328_v4 = vld [vmem:[#allocation6 + $0x60] sm:$0xf]  ;;  %v1405_v5 = vld [vmem:[#allocation6 + $0x64] sm:$0xf0]  ;;  %568 = vmatpush.bf16.msra.mxu0 %v1391_v0 }
  0x2f   : > { %v1337_v3 = vor.u32 %v1407_v2, %v1336_v1  ;;  %v1390_v6 = vld [vmem:[#allocation2 + $0x30] sm:$0xff]  ;;  %v1329_v7 = vor.u32 %v1405_v5, %v1328_v4  ;;  %v1403_v9 = vld [vmem:[#allocation6 + $0x54] sm:$0xf0]  ;;  %v1389_v10 = vld [vmem:[#allocation2 + $0x28] sm:$0xff]  ;;  %s2047_s17 = smov (!%p483_p6, %s1885_s17), 1  ;;  %vm712_vm0 = vcmask 261120  }
  0x30   : > { %v1320_v8 = vld [vmem:[#allocation6 + $0x50] sm:$0xf]  ;;  %v1312_v12 = vld [vmem:[#allocation6 + $0x40] sm:$0xf]  ;;  %v1401_v13 = vld [vmem:[#allocation6 + $0x44] sm:$0xf0] }
  0x31   : > { %683 = vmatpush.bf16.msra.mxu1 %v1337_v3  ;;  %v1321_v11 = vor.u32 %v1403_v9, %v1320_v8  ;;  %v1406_v14 = vld [vmem:[#allocation6 + $0x74] sm:$0xf]  ;;  %v1338_v15 = vld [vmem:[#allocation6 + $0x78] sm:$0xf0]  ;;  %v1404_v16 = vld [vmem:[#allocation6 + $0x64] sm:$0xf]  ;;  %v1313_v20 = vor.u32 %v1401_v13, %v1312_v12 }
  0x32   : > { %569 = vmatpush.bf16.msra.mxu0 %v1390_v6  ;;  %v1330_v17 = vld [vmem:[#allocation6 + $0x68] sm:$0xf0]  ;;  %v1388_v18 = vld [vmem:[#allocation2 + $0x20] sm:$0xff]  ;;  %v1341_v19 = vor.u32 %v1406_v14, %v1338_v15  ;;  %v1304_v21 = vld [vmem:[#allocation6 + $0x30] sm:$0xf]  ;;  %s1963_s2 = sshll.u32 %s2047_s17, 3 }
  0x33   : > { %v1399_v22 = vld [vmem:[#allocation6 + $0x34] sm:$0xf0]  ;;  %v1333_v23 = vor.u32 %v1404_v16, %v1330_v17  ;;  %v1402_v24 = vld [vmem:[#allocation6 + $0x54] sm:$0xf]  ;;  %v1322_v25 = vld [vmem:[#allocation6 + $0x58] sm:$0xf0]  ;;  %s486_s20 = scalar_lea.vmem %s2031_s0, %s1963_s2  ;;  %s490_s17 = scalar_lea.vmem %s2032_s1, %s1963_s2 }
  0x34   : > { %696 = vmatpush.bf16.msra.mxu2 %v1341_v19  ;;  %v1387_v26 = vld [vmem:[#allocation2 + $0x18] sm:$0xff]  ;;  %v1305_v27 = vor.u32 %v1399_v22, %v1304_v21  ;;  %v1296_v28 = vld [vmem:[#allocation6 + $0x20] sm:$0xf]  ;;  %v1397_v29 = vld [vmem:[#allocation6 + $0x24] sm:$0xf0]  ;;  %v1325_v30 = vor.u32 %v1402_v24, %v1322_v25  ;;  %s1817_s11 = smov 64   ;;  %s494_s15 = scalar_lea.vmem %s2041_s10, %s1963_s2 }
  0x35   : > { %684 = vmatpush.bf16.msra.mxu1 %v1329_v7  ;;  %v1400_v31 = vld [vmem:[#allocation6 + $0x44] sm:$0xf]  ;;  %v1314_v32 = vld [vmem:[#allocation6 + $0x48] sm:$0xf0]  ;;  %v1297_v34 = vor.u32 %v1397_v29, %v1296_v28  ;;  %v1288_v35 = vld [vmem:[#allocation6 + $0x10] sm:$0xf] }
  0x36   : > { %570 = vmatpush.bf16.msra.mxu0 %v1389_v10  ;;  %v1386_v33 = vld [vmem:[#allocation2 + $0x10] sm:$0xff]  ;;  %v1395_v36 = vld [vmem:[#allocation6 + $0x14] sm:$0xf0]  ;;  %v1317_v37 = vor.u32 %v1400_v31, %v1314_v32  ;;  %v1306_v39 = vld [vmem:[#allocation6 + $0x38] sm:$0xf0]  ;;  %s1818_s12 = smov 96  }
  0x37   : > { %v1398_v38 = vld [vmem:[#allocation6 + $0x34] sm:$0xf]  ;;  %v1385_v40 = vld [vmem:[#allocation2 + $0x8] sm:$0xff]  ;;  %v1289_v41 = vor.u32 %v1395_v36, %v1288_v35  ;;  %v1280_v42 = vld [vmem:[#allocation6] sm:$0xf]  ;;  %s1819_s14 = smov 32  }
  0x38   : > { %697 = vmatpush.bf16.msra.mxu2 %v1333_v23  ;;  %v1393_v43 = vld [vmem:[#allocation6 + $0x4] sm:$0xf0]  ;;  %v1309_v44 = vor.u32 %v1398_v38, %v1306_v39  ;;  %v1396_v45 = vld [vmem:[#allocation6 + $0x24] sm:$0xf]  ;;  %v1298_v46 = vld [vmem:[#allocation6 + $0x28] sm:$0xf0] }
  0x39   : > { %685 = vmatpush.bf16.msra.mxu1 %v1321_v11  ;;  %v1384_v47 = vld [vmem:[#allocation2] sm:$0xff]  ;;  %v1281_v49 = vor.u32 %v1393_v43, %v1280_v42  ;;  %v1301_v51 = vor.u32 %v1396_v45, %v1298_v46  ;;  %v1394_v53 = vld [vmem:[#allocation6 + $0x14] sm:$0xf]  ;;  %v1282_v58 = vld [vmem:[#allocation6 + $0x8] sm:$0xf0]  ;;  %vm749_vm1 = vcmask 1043456  }
  0x3a   : > { %571 = vmatpush.bf16.msra.mxu0 %v1388_v18  ;;  %v1973_v48 = vld [vmem:[%s486_s20] sm:$0xff]  ;;  %vm733_vm2 = vcmask 64512   ;;  %vm953_vm3 = vcmask 523264   ;;  %vm955_vm4 = vcmask 785408  }
  0x3b   : > { %v497_v50 = vld [vmem:[%s490_s17] sm:$0xff]  ;;  %v498_v52 = vpack.c.bf16 %v1973_v48, %v1973_v48 }
  0x3c   : > { %698 = vmatpush.bf16.msra.mxu2 %v1325_v30  ;;  %v1290_v54 = vld [vmem:[#allocation6 + $0x18] sm:$0xf0]  ;;  %v499_v55 = vpack.c.bf16 %v497_v50, %v497_v50  ;;  %v1392_v57 = vld [vmem:[#allocation6 + $0x4] sm:$0xf]  ;;  %v597_v60 = vld [vmem:[#allocation7] sm:$0x3] }
  0x3d   : > { %686 = vmatpush.bf16.msra.mxu1 %v1313_v20  ;;  %v1293_v56 = vor.u32 %v1394_v53, %v1290_v54  ;;  %v1285_v59 = vor.u32 %v1392_v57, %v1282_v58  ;;  %v599_v61 = vperm.slane %v597_v60, 0  ;;  %v1513_v0 = vld [vmem:[#allocation4] ss:$0 sm:$0xff]  ;;  %v600_v9 = vperm.slane %v597_v60, 1 }
  0x3e   : > { %572 = vmatpush.bf16.msra.mxu0 %v1387_v26 }
  0x40   : > { %699 = vmatpush.bf16.msra.mxu2 %v1317_v37 }
  0x41   : > { %687 = vmatpush.bf16.msra.mxu1 %v1305_v27 }
  0x42   : > { %573 = vmatpush.bf16.msra.mxu0 %v1386_v33 }
  0x44   : > { %700 = vmatpush.bf16.msra.mxu2 %v1309_v44 }
  0x45   : > { %688 = vmatpush.bf16.msra.mxu1 %v1297_v34 }
  0x46   : > { %574 = vmatpush.bf16.msra.mxu0 %v1385_v40 }
  0x48   : > { %701 = vmatpush.bf16.msra.mxu2 %v1301_v51 }
  0x49   : > { %689 = vmatpush.bf16.msra.mxu1 %v1289_v41 }
  0x4a   : > { %575 = vmatpush.bf16.msra.mxu0 %v1384_v47 }
  0x4c   : > { %702 = vmatpush.bf16.msra.mxu2 %v1293_v56 }
  0x4d   : > { %690 = vmatpush.bf16.msra.mxu1 %v1281_v49  ;;  %576 = vmatmul.bf16.vlgmr.msra.gmra.mxu0 %v498_v52 }
  0x50   : > { %691 = vmatmul.bf16.vlgmr.msra.gmra.mxu1 %v499_v55  ;;  %703 = vmatpush.bf16.msra.mxu2 %v1285_v59 }
  0x53   : > { %704 = vmatmul.bf16.vlgmr.msra.gmra.mxu2 %v499_v55 }
  0xca   : > { %v577_v62 = vpop.f32.mrf.mxu0 }
  0xcb   : > { %v578_v3 = vadd.f32 %v1513_v0, %v577_v62 }
  0xcd   : > { %v692_v63 = vpop.f32.mrf.mxu1  ;;  %v709_v7 = vpack.c.bf16 %v578_v3, %v578_v3 }
  0xce   : > { %v693_v1 = vadd.f32 %v692_v63, %v599_v61 }
  0xd0   : > { %v710_v2 = vpack.c.bf16 %v693_v1, %v693_v1 }
  0xd2   : > { %828 = vrot.lane.b32.xlu2 %v710_v2, %s1817_s11  ;;  %770 = vrot.lane.b32.xlu1 %v710_v2, %s1818_s12  ;;  %v717_v4 = vsel %vm712_vm0, %v710_v2, 0  ;;  %v579_v5 = vpop.f32.mrf.mxu0 }
  0xd3   : > { %726 = vmatpush.bf16.xpose.msra.mxu3 %v717_v4 }
  0xd5   : > { %v694_v6 = vpop.f32.mrf.mxu1 }
  0xd6   : > { %v705_v8 = vpop.f32.mrf.mxu2 }
  0xd7   : > { %v706_v10 = vadd.f32 %v705_v8, %v600_v9 }
  0xd9   : > { %v1984_v12 = vpack.c.bf16 %v706_v10, %v706_v10 }
  0xda   : > { %885 = vrot.lane.b32.xlu2 %v710_v2, %s1819_s14  ;;  %767 = vrot.lane.b32.xlu1 %v709_v7, %s1818_s12 }
  0xdb   : > { %1342 = vmatmul.msk.bf16.vlgmr.msra.gmra.mxu3 %vm712_vm0, %v709_v7  ;;  %v751_v13 = vsel %vm749_vm1, %v1984_v12, 0 }
  0xdc   : > { %760 = vmatpush.bf16.msrb.mxu3 %v751_v13 }
  0xde   : > { %v707_v11 = vpop.f32.mrf.mxu2 }
  0xe2   : > { %883 = vrot.lane.b32.xlu1 %v709_v7, %s1819_s14 }
 0x12c   : > { %v829_v14 = vpop.permute.xlu2 %828 }
 0x12d   : > { %v834_v15 = vsel %vm712_vm0, %v829_v14, 0 }
 0x12e   : > { %843 = vmatpush.bf16.xpose.msrb.mxu2 %v834_v15 }
 0x134   : > { %v886_v30 = vpop.permute.xlu2 %885 }
 0x135   : > { %v891_v32 = vsel %vm712_vm0, %v886_v30, 0  ;;  %v1411_v30 = vld [vmem:[#allocation9 + $0x18] sm:$0xff] }
 0x144   : > { %v771_v16 = vpop.permute.xlu1 %770 }
 0x145   : > { %v776_v17 = vsel %vm712_vm0, %v771_v16, 0 }
 0x146   : > { %785 = vmatpush.bf16.xpose.msra.mxu3 %v776_v17 }
 0x14c   : > { %v768_v34 = vpop.permute.xlu1 %767 }
 0x154   : > { %v884_v35 = vpop.permute.xlu1 %883 }
 0x15e   : > { %v728_v18 = vpop.f32.mrf.mxu3 }
 0x15f   : > { %v732_v19 = vmul.f32 0.17677669, %v728_v18 }
 0x161   : > { %v734_v20 = vsel %vm733_vm2, %v732_v19, -inf }
 0x162   : > { %735 = vmax.xlane.f32.xlu0 %v734_v20 }
 0x166   : > { %v730_v21 = vpop.f32.mrf.mxu3 }
 0x1d5   : > { %v736_v22 = vpop.xlane.xlu0 %735 }
 0x1d6   : > { %v737_v23 = vsub.f32 %v732_v19, %v736_v22 }
 0x1d8   : > { %v738_v24 = vmul.f32 1.442695, %v737_v23 }
 0x1da   : > { %1517 = vpow2.f32 %v738_v24 }
 0x1e0   : > { %v1518_v25 = vpop.eup %1517 }
 0x1e1   : > { %v740_v26 = vsel %vm733_vm2, %v1518_v25, 0.0 }
 0x1e2   : > { %741 = vadd.xlane.f32.xlu0 %v740_v26  ;;  %v1415_v26 = vld [vmem:[#allocation9 + $0x38] sm:$0xff] }
 0x1e3   : > { %1026 = vmatpush.bf16.msrb.mxu1 %v1415_v26 }
 0x1f6   : > { %826 = vrot.lane.b32.xlu0 %v709_v7, %s1817_s11 }
 0x255   : > { %v742_v27 = vpop.xlane.xlu0 %741 }
 0x256   : > { %1519 = vrcp.f32 %v742_v27  ;;  %v1414_v27 = vld [vmem:[#allocation9 + $0x30] sm:$0xff] }
 0x257   : > { %1027 = vmatpush.bf16.msrb.mxu1 %v1414_v27 }
 0x25c   : > { %v1520_v28 = vpop.eup %1519 }
 0x25d   : > { %v744_v29 = vmul.f32 %v1520_v28, %v1518_v25  ;;  %v1413_v28 = vld [vmem:[#allocation9 + $0x28] sm:$0xff] }
 0x25e   : > { %1028 = vmatpush.bf16.msrb.mxu1 %v1413_v28 }
 0x25f   : > { %v745_v31 = vpack.c.bf16 %v744_v29, %v744_v29  ;;  %v1412_v29 = vld [vmem:[#allocation9 + $0x20] sm:$0xff] }
 0x261   : > { %1343 = vmatmul.msk.bf16.vlgmr.msrb.gmra.mxu3 %vm733_vm2, %v745_v31  ;;  %v1410_v31 = vld [vmem:[#allocation9 + $0x10] sm:$0xff] }
 0x262   : > { %900 = vmatpush.bf16.xpose.msrb.mxu3 %v891_v32  ;;  %1029 = vmatpush.bf16.msrb.mxu1 %v1412_v29  ;;  %v1409_v32 = vld [vmem:[#allocation9 + $0x8] sm:$0xff] }
 0x266   : > { %1030 = vmatpush.bf16.msrb.mxu1 %v1411_v30 }
 0x268   : > { %v827_v33 = vpop.permute.xlu0 %826 }
 0x269   : > { %1346 = vmatmul.msk.bf16.vlgmr.msrb.gmra.mxu2 %vm712_vm0, %v827_v33  ;;  %v1408_v33 = vld [vmem:[#allocation9] sm:$0xff] }
 0x26a   : > { %1031 = vmatpush.bf16.msrb.mxu1 %v1410_v31 }
 0x26e   : > { %1032 = vmatpush.bf16.msrb.mxu1 %v1409_v32 }
 0x271   : > { %1344 = vmatmul.msk.bf16.vlgmr.msra.gmra.mxu3 %vm712_vm0, %v768_v34 }
 0x272   : > { %1033 = vmatpush.bf16.msrb.mxu1 %v1408_v33 }
 0x281   : > { %1348 = vmatmul.msk.bf16.vlgmr.msrb.gmra.mxu3 %vm712_vm0, %v884_v35 }
 0x2e4   : > { %v1998_v36 = vpop.f32.mrf.mxu3 }
 0x2ec   : > { %v764_v37 = vpop.f32.mrf.mxu3  ;;  %v845_v38 = vpop.f32.mrf.mxu2 }
 0x2ed   : > { %v849_v39 = vmul.f32 0.17677669, %v845_v38 }
 0x2ef   : > { %v850_v40 = vsel %vm733_vm2, %v849_v39, -inf }
 0x2f0   : > { %851 = vmax.xlane.f32.xlu1 %v850_v40 }
 0x2f4   : > { %v787_v41 = vpop.f32.mrf.mxu3  ;;  %v847_v42 = vpop.f32.mrf.mxu2 }
 0x2f5   : > { %v791_v43 = vmul.f32 0.17677669, %v787_v41  ;;  %v1514_v42 = vld [vmem:[#allocation10] ss:$0 sm:$0xff] }
 0x2f7   : > { %v792_v44 = vsel %vm733_vm2, %v791_v43, -inf }
 0x2f8   : > { %793 = vmax.xlane.f32.xlu2 %v792_v44 }
 0x2fc   : > { %v789_v45 = vpop.f32.mrf.mxu3 }
 0x304   : > { %v902_v46 = vpop.f32.mrf.mxu3 }
 0x305   : > { %v906_v47 = vmul.f32 0.17677669, %v902_v46 }
 0x307   : > { %v907_v49 = vsel %vm733_vm2, %v906_v47, -inf }
 0x308   : > { %908 = vmax.xlane.f32.xlu0 %v907_v49 }
 0x30c   : > { %v904_v50 = vpop.f32.mrf.mxu3 }
 0x31c   : > { %862 = vrot.lane.b32.xlu0 %v1984_v12, %s1817_s11 }
 0x363   : > { %v852_v51 = vpop.xlane.xlu1 %851 }
 0x364   : > { %v853_v52 = vsub.f32 %v849_v39, %v852_v51 }
 0x366   : > { %v854_v53 = vmul.f32 1.442695, %v853_v52 }
 0x368   : > { %1521 = vpow2.f32 %v854_v53 }
 0x36b   : > { %v794_v54 = vpop.xlane.xlu2 %793 }
 0x36c   : > { %v795_v55 = vsub.f32 %v791_v43, %v794_v54 }
 0x36e   : > { %v1522_v56 = vpop.eup %1521  ;;  %v796_v57 = vmul.f32 1.442695, %v795_v55 }
 0x36f   : > { %v856_v58 = vsel %vm733_vm2, %v1522_v56, 0.0 }
 0x370   : > { %1523 = vpow2.f32 %v796_v57  ;;  %857 = vadd.xlane.f32.xlu1 %v856_v58 }
 0x376   : > { %v1524_v59 = vpop.eup %1523 }
 0x377   : > { %v798_v60 = vsel %vm733_vm2, %v1524_v59, 0.0 }
 0x378   : > { %799 = vadd.xlane.f32.xlu2 %v798_v60 }
 0x37b   : > { %v909_v61 = vpop.xlane.xlu0 %908 }
 0x37c   : > { %v910_v62 = vsub.f32 %v906_v47, %v909_v61  ;;  %v1820_v47 = vmov 128.0  }
 0x37e   : > { %v911_v63 = vmul.f32 1.442695, %v910_v62 }
 0x380   : > { %1525 = vpow2.f32 %v911_v63 }
 0x386   : > { %v1526_v0 = vpop.eup %1525 }
 0x387   : > { %v913_v1 = vsel %vm733_vm2, %v1526_v0, 0.0 }
 0x388   : > { %914 = vadd.xlane.f32.xlu1 %v913_v1 }
 0x38e   : > { %v863_v2 = vpop.permute.xlu0 %862 }
 0x38f   : > { %v868_v3 = vsel %vm749_vm1, %v863_v2, 0  ;;  %v1515_v2 = vld [vmem:[#allocation12] ss:$0 sm:$0xff] }
 0x390   : > { %805 = vrot.lane.b32.xlu2 %v1984_v12, %s1818_s12  ;;  %877 = vmatpush.bf16.msra.mxu2 %v868_v3 }
 0x3a1   : > { %919 = vrot.lane.b32.xlu1 %v1984_v12, %s1819_s14 }
 0x3e3   : > { %v858_v4 = vpop.xlane.xlu1 %857 }
 0x3e4   : > { %1527 = vrcp.f32 %v858_v4  ;;  %v1516_v4 = vld [vmem:[#allocation13] ss:$0 sm:$0xff] }
 0x3ea   : > { %v1528_v5 = vpop.eup %1527 }
 0x3eb   : > { %v860_v6 = vmul.f32 %v1528_v5, %v1522_v56  ;;  %v800_v7 = vpop.xlane.xlu2 %799 }
 0x3ec   : > { %1529 = vrcp.f32 %v800_v7 }
 0x3ed   : > { %v861_v8 = vpack.c.bf16 %v860_v6, %v860_v6 }
 0x3ef   : > { %1347 = vmatmul.msk.bf16.vlgmr.msra.gmra.mxu2 %vm733_vm2, %v861_v8 }
 0x3f2   : > { %v1530_v9 = vpop.eup %1529 }
 0x3f3   : > { %v802_v10 = vmul.f32 %v1530_v9, %v1524_v59  ;;  %v806_v11 = vpop.permute.xlu2 %805 }
 0x3f4   : > { %v811_v13 = vsel %vm749_vm1, %v806_v11, 0 }
 0x3f5   : > { %820 = vmatpush.bf16.msrb.mxu0 %v811_v13  ;;  %v803_v14 = vpack.c.bf16 %v802_v10, %v802_v10 }
 0x3f8   : > { %1345 = vmatmul.msk.bf16.vlgmr.msrb.gmra.mxu0 %vm733_vm2, %v803_v14 }
 0x3fb   : > { %v915_v15 = vpop.xlane.xlu1 %914 }
 0x3fc   : > { %1531 = vrcp.f32 %v915_v15 }
 0x3fd   : > { %1533 = vrcp.f32 %v1820_v47 }
 0x402   : > { %v1532_v12 = vpop.eup %1531 }
 0x403   : > { %v917_v16 = vmul.f32 %v1532_v12, %v1526_v0  ;;  %v1534_v49 = vpop.eup %1533 }
 0x404   : > { %v1043_v50 = vmul.f32 128.0, %v1534_v49  ;;  %vm1047_vm5 = vweird.f32 %v1534_v49 }
 0x405   : > { %v918_v19 = vpack.c.bf16 %v917_v16, %v917_v16 }
 0x406   : > { %v1044_v51 = vsub.f32 1.0, %v1043_v50 }
 0x408   : > { %v1045_v52 = vmul.f32 %v1534_v49, %v1044_v51 }
 0x40a   : > { %v1046_v53 = vadd.f32 %v1534_v49, %v1045_v52 }
 0x413   : > { %v920_v17 = vpop.permute.xlu1 %919 }
 0x414   : > { %v925_v18 = vsel %vm749_vm1, %v920_v17, 0 }
 0x415   : > { %934 = vmatpush.bf16.msra.mxu0 %v925_v18 }
 0x418   : > { %1349 = vmatmul.msk.bf16.vlgmr.msra.gmra.mxu0 %vm733_vm2, %v918_v19 }
 0x472   : > { %v879_v20 = vpop.f32.mrf.mxu2 }
 0x475   : > { %v822_v21 = vpop.f32.mrf.mxu0 }
 0x476   : > { %941 = vrot.lane.b32.xlu2 %v822_v21, %s1819_s14 }
 0x47a   : > { %v881_v22 = vpop.f32.mrf.mxu2 }
 0x47d   : > { %v824_v23 = vpop.f32.mrf.mxu0 }
 0x47e   : > { %945 = vrot.lane.b32.xlu2 %v879_v20, %s1817_s11 }
 0x495   : > { %v936_v24 = vpop.f32.mrf.mxu0 }
 0x496   : > { %949 = vrot.lane.b32.xlu0 %v936_v24, %s1818_s12 }
 0x49d   : > { %v938_v25 = vpop.f32.mrf.mxu0 }
 0x4d0   : > { %v942_v34 = vpop.permute.xlu2 %941 }
 0x4d1   : > { %v952_v37 = vsel %vm712_vm0, %v1998_v36, %v942_v34  ;;  %v1048_v36 = vsel %vm1047_vm5, %v1534_v49, %v1046_v53 }
 0x4d8   : > { %v946_v35 = vpop.permute.xlu2 %945 }
 0x4d9   : > { %v954_v38 = vsel %vm953_vm3, %v952_v37, %v946_v35 }
 0x508   : > { %v950_v39 = vpop.permute.xlu0 %949 }
 0x509   : > { %v956_v40 = vsel %vm955_vm4, %v954_v38, %v950_v39 }
 0x50a   : > { %v957_v41 = vpack.c.bf16 %v956_v40, %v956_v40 }
 0x50c   : > { %1034 = vmatmul.bf16.vlgmr.msrb.gmra.mxu1 %v957_v41 }
 0x589   : > { %v1035_v43 = vpop.f32.mrf.mxu1 }
 0x58a   : > { %v1036_v44 = vadd.f32 %v1514_v42, %v1035_v43 }
 0x58c   : > { %v1039_v45 = vadd.f32 %v1036_v44, %v1973_v48 }
 0x58e   : > { %1040 = vadd.xlane.f32.xlu2 %v1039_v45 }
 0x591   : > { %v1037_v46 = vpop.f32.mrf.mxu1 }
 0x601   : > { %v1041_v54 = vpop.xlane.xlu2 %1040 }
 0x602   : > { %v1049_v55 = vmul.f32 %v1048_v36, %v1041_v54 }
 0x604   : > { %v1050_v56 = vsub.f32 %v1039_v45, %v1049_v55 }
 0x606   : > { %v1051_v57 = vmul.f32 %v1050_v56, %v1050_v56 }
 0x608   : > { %1052 = vadd.xlane.f32.xlu0 %v1051_v57 }
 0x67b   : > { %v1053_v58 = vpop.xlane.xlu0 %1052 }
 0x67c   : > { %v1054_v59 = vmul.f32 %v1053_v58, %v1048_v36 }
 0x67e   : > { %v1055_v60 = vadd.f32 1e-05, %v1054_v59 }
 0x680   : > { %1535 = vrsqrt.f32 %v1055_v60  ;;  %vm1062_vm7 = vweird.f32 %v1055_v60 }
 0x686   : > { %v1536_v48 = vpop.eup %1535 }
 0x687   : > { %v1057_v61 = vmul.f32 %v1536_v48, %v1055_v60  ;;  %vm1063_vm6 = vweird.f32 %v1536_v48 }
 0x688   : > { %vm1064_vm8 = vmor %vm1062_vm7, %vm1063_vm6 }
 0x689   : > { %v1058_v62 = vmul.f32 %v1536_v48, %v1057_v61 }
 0x68b   : > { %v1059_v63 = vmul.f32 0.5, %v1058_v62 }
 0x68d   : > { %v1060_v0 = vsub.f32 1.5, %v1059_v63 }
 0x68f   : > { %v1061_v1 = vmul.f32 %v1536_v48, %v1060_v0 }
 0x691   : > { %v1065_v3 = vsel %vm1064_vm8, %v1536_v48, %v1061_v1 }
 0x692   : > { %v1066_v5 = vmul.f32 %v1065_v3, %v1050_v56 }
 0x694   : > { %v1071_v6 = vmul.f32 %v1515_v2, %v1066_v5 }
 0x696   : > { %v1076_v7 = vadd.f32 %v1516_v4, %v1071_v6 }
 0x698   : > { %1077 = vst [vmem:[%s494_s15] sm:$0xff] %v1076_v7 }
 0x699 PF: > { %s25_s13 = sadd.s32 1, %s1803_s13  }
 0x69a   : > { %p22_p7 = scmp.ge.s32.totalorder %s25_s13, 4  }
 0x69c   :  { %24 = sbr.rel (!%p22_p7) target bundleno = 7 (0x7), region = 126 }
 0x6a1   :  { %1097 = vsyncpa [#allocation3], 1 }
 0x6a2   :  { %1099 = vsyncpa [#allocation3 + $0x1], 1 }
 0x6a3   :  { %1100 = vsyncpa [#allocation5], 1 }
 0x6a4   :  { %1101 = vsyncpa [#allocation8], 1 }
 0x6a5   :  { %1102 = vsyncpa [#allocation11], 1 }
 0x6a6   :  { %1103 = vsyncpa [#allocation14], 1 }

</bundles_post_ra>
